<compile_context>
chip_gen: v7x
topology: tpu7x:2x2x1
jax: 0.10.0
libtpu: 0.0.40
codegen_flags: <defaults>
</compile_context>

<pallas_src>
import functools
import math

import jax
import jax.numpy as jnp
from jax.experimental import pallas as pl
from jax.experimental.pallas import tpu as pltpu

LN_EPS = 1e-5  # torch.nn.LayerNorm default


# ----------------------------- in-kernel helpers -----------------------------
def _layernorm_t(x, w, b):
    """LayerNorm of a feature-major (D, N) activation; w/b are (D, 1)."""
    mean = jnp.mean(x, axis=0, keepdims=True)
    meansq = jnp.mean(x * x, axis=0, keepdims=True)
    var = meansq - mean * mean                  # biased variance, like torch
    return (x - mean) * jax.lax.rsqrt(var + LN_EPS) * w + b


def _gelu_exact(x):
    # nn.GELU() default: exact erf-based GELU
    return 0.5 * x * (1.0 + jax.lax.erf(x * (1.0 / math.sqrt(2.0))))


# ------------------------------- Pallas kernel --------------------------------
def transformer_kernel(x_ref,
                       aln_w_ref, aln_b_ref, wqkv_ref, wout_ref, bout_ref,
                       fln_w_ref, fln_b_ref, w1_ref, b1_ref, w2_ref, b2_ref,
                       o_ref, x_scr, *, heads, dim_head, seq):
    l = pl.program_id(1)
    f32 = jnp.float32
    bf16 = jnp.bfloat16
    inner = heads * dim_head

    @pl.when(l == 0)
    def _():
        # Load this batch's activation once, feature-major (D, N).
        x_scr[...] = x_ref[0].astype(f32).T

    x = x_scr[...]                                             # (D, N) f32

    # ---------------------- PreNorm(Attention) + residual ----------------------
    xn = _layernorm_t(x, aln_w_ref[0], aln_b_ref[0]).astype(bf16)
    # (3*inner, D) @ (D, N) -> (3*inner, N); softmax scale folded into Q rows.
    qkv = jnp.dot(wqkv_ref[0], xn, preferred_element_type=f32)
    qkv = qkv.reshape(3, heads, dim_head, seq)                 # leading-dim split
    q_t, k_t, v_t = qkv[0], qkv[1], qkv[2]                     # (h, dh, N) each

    # One batched matmul over all heads: (h, Nq, dh) x (h, dh, Nk) -> (h, Nq, Nk)
    q = jnp.transpose(q_t, (0, 2, 1)).astype(bf16)
    dots = jax.lax.dot_general(q, k_t.astype(bf16),
                               (((2,), (1,)), ((0,), (0,))),
                               preferred_element_type=f32)
    m = jnp.max(dots, axis=-1, keepdims=True)
    e = jnp.exp(dots - m)
    s = jnp.sum(e, axis=-1, keepdims=True)
    p = e * pl.reciprocal(s, approx=True)                      # EUP vrcp

    # (h, dh, Nk) x (h, Nk, Nq) -> (h, dh, Nq)  == per-head (P @ V)^T
    p_t = jnp.transpose(p, (0, 2, 1)).astype(bf16)
    o_t = jax.lax.dot_general(v_t.astype(bf16), p_t,
                              (((2,), (1,)), ((0,), (0,))),
                              preferred_element_type=f32)
    o_flat = o_t.reshape(inner, seq).astype(bf16)              # leading-dim merge
    # Single 32-deep output projection: (D, inner) @ (inner, N)
    attn = jnp.dot(wout_ref[0], o_flat, preferred_element_type=f32)
    x = x + attn + bout_ref[0]

    # --------------------- PreNorm(FeedForward) + residual ---------------------
    xn = _layernorm_t(x, fln_w_ref[0], fln_b_ref[0]).astype(bf16)
    h1 = jnp.dot(w1_ref[0], xn, preferred_element_type=f32) + b1_ref[0]
    h1 = _gelu_exact(h1).astype(bf16)
    x = x + jnp.dot(w2_ref[0], h1, preferred_element_type=f32) + b2_ref[0]

    x_scr[...] = x

    @pl.when(l == pl.num_programs(1) - 1)
    def _():
        o_ref[0] = x.T.astype(o_ref.dtype)


# ----------------------------- pallas_call wrapper -----------------------------
def transformer_forward(x, packed, *, heads, dim_head):
    B, N, D = x.shape
    depth = packed["w_qkv"].shape[0]
    inner = heads * dim_head
    mlp = packed["w1"].shape[1]

    kernel = functools.partial(transformer_kernel, heads=heads,
                               dim_head=dim_head, seq=N)

    xmap = lambda b, l: (b, 0, 0)      # activation / output: one block per batch
    wmap = lambda b, l: (l, 0, 0)      # weights: streamed per layer (depth axis)

    grid_spec = pltpu.PrefetchScalarGridSpec(
        num_scalar_prefetch=0,
        grid=(B, depth),
        in_specs=[
            pl.BlockSpec((1, N, D), xmap),
            pl.BlockSpec((1, D, 1), wmap),            # attn LN weight
            pl.BlockSpec((1, D, 1), wmap),            # attn LN bias
            pl.BlockSpec((1, 3 * inner, D), wmap),    # W_qkv (bf16)
            pl.BlockSpec((1, D, inner), wmap),        # W_out (bf16)
            pl.BlockSpec((1, D, 1), wmap),            # b_out
            pl.BlockSpec((1, D, 1), wmap),            # ff LN weight
            pl.BlockSpec((1, D, 1), wmap),            # ff LN bias
            pl.BlockSpec((1, mlp, D), wmap),          # W1 (bf16)
            pl.BlockSpec((1, mlp, 1), wmap),          # b1
            pl.BlockSpec((1, D, mlp), wmap),          # W2 (bf16)
            pl.BlockSpec((1, D, 1), wmap),            # b2
        ],
        out_specs=pl.BlockSpec((1, N, D), xmap),
        scratch_shapes=[pltpu.VMEM((D, N), jnp.float32)],   # resident activation
    )

    return pl.pallas_call(
        kernel,
        out_shape=jax.ShapeDtypeStruct((B, N, D), x.dtype),
        grid_spec=grid_spec,
        compiler_params=pltpu.CompilerParams(
            dimension_semantics=("parallel", "arbitrary")),
    )(x, packed["aln_w"], packed["aln_b"], packed["w_qkv"], packed["w_out"],
      packed["b_out"], packed["fln_w"], packed["fln_b"], packed["w1"],
      packed["b1"], packed["w2"], packed["b2"])


# ------------------------------ params & packing -------------------------------
def init_params(key, depth, dim, heads, dim_head, mlp_dim):
    """Per-layer params in torch nn.Linear layout: weight = (out, in)."""
    inner = heads * dim_head
    layers = []
    for _ in range(depth):
        key, k1, k2, k3, k4, k5, k6, k7, k8, k9 = jax.random.split(key, 10)
        attn = {
            "ln_w": 1.0 + 0.1 * jax.random.normal(k1, (dim,), jnp.float32),
            "ln_b": 0.1 * jax.random.normal(k2, (dim,), jnp.float32),
            "w_qkv": 0.02 * jax.random.normal(k3, (3 * inner, dim), jnp.float32),
            "w_out": 0.02 * jax.random.normal(k4, (dim, inner), jnp.float32),
            "b_out": 0.02 * jax.random.normal(k5, (dim,), jnp.float32),
        }
        ff = {
            "ln_w": 1.0 + 0.1 * jax.random.normal(k6, (dim,), jnp.float32),
            "ln_b": 0.1 * jax.random.normal(k7, (dim,), jnp.float32),
            "w1": 0.02 * jax.random.normal(k8, (mlp_dim, dim), jnp.float32),
            "b1": 0.02 * jax.random.normal(k9, (mlp_dim,), jnp.float32),
            "w2": 0.02 * jax.random.normal(jax.random.fold_in(k9, 1),
                                           (dim, mlp_dim), jnp.float32),
            "b2": 0.02 * jax.random.normal(jax.random.fold_in(k9, 2),
                                           (dim,), jnp.float32),
        }
        layers.append({"attn": attn, "ff": ff})
    return layers


def pack_params(layers, heads, dim_head):
    """Stack per-layer params along depth; fold softmax scale; bf16 GEMM weights."""
    inner = heads * dim_head
    scale = dim_head ** (-0.5)
    bf16 = jnp.bfloat16

    def stack(block, name):
        return jnp.stack([l[block][name] for l in layers], axis=0)

    def col(a):                     # (depth, D) -> (depth, D, 1) column vectors
        return a[..., None]

    w_qkv = stack("attn", "w_qkv")                       # (depth, 3*inner, D)
    w_qkv = w_qkv.at[:, :inner, :].multiply(scale)       # fold scale into Q rows
    return {
        "aln_w": col(stack("attn", "ln_w")),
        "aln_b": col(stack("attn", "ln_b")),
        "w_qkv": w_qkv.astype(bf16),
        "w_out": stack("attn", "w_out").astype(bf16),
        "b_out": col(stack("attn", "b_out")),
        "fln_w": col(stack("ff", "ln_w")),
        "fln_b": col(stack("ff", "ln_b")),
        "w1": stack("ff", "w1").astype(bf16),
        "b1": col(stack("ff", "b1")),
        "w2": stack("ff", "w2").astype(bf16),
        "b2": col(stack("ff", "b2")),
    }


# --------------------------------- reference -----------------------------------
def ref_forward(x, layers, heads, dim_head):
    """Pure-JAX f32 reference mirroring the PyTorch module."""
    def ln(t, w, b):
        m = jnp.mean(t, axis=-1, keepdims=True)
        v = jnp.mean((t - m) ** 2, axis=-1, keepdims=True)
        return (t - m) / jnp.sqrt(v + LN_EPS) * w + b

    B, N, D = x.shape
    scale = dim_head ** (-0.5)
    for layer in layers:
        a, f = layer["attn"], layer["ff"]
        xn = ln(x, a["ln_w"], a["ln_b"])
        qkv = xn @ a["w_qkv"].T
        q, k, v = jnp.split(qkv, 3, axis=-1)
        reh = lambda t: t.reshape(B, N, heads, dim_head).transpose(0, 2, 1, 3)
        q, k, v = reh(q), reh(k), reh(v)
        dots = jnp.einsum("bhnd,bhmd->bhnm", q, k) * scale
        attn = jax.nn.softmax(dots, axis=-1)
        out = jnp.einsum("bhnm,bhmd->bhnd", attn, v)
        out = out.transpose(0, 2, 1, 3).reshape(B, N, heads * dim_head)
        x = out @ a["w_out"].T + a["b_out"] + x

        xn = ln(x, f["ln_w"], f["ln_b"])
        h = xn @ f["w1"].T + f["b1"]
        h = 0.5 * h * (1.0 + jax.lax.erf(h / jnp.sqrt(2.0)))
        x = h @ f["w2"].T + f["b2"] + x
    return x


# ----------------------------------- main --------------------------------------
if __name__ == "__main__":
    B, N, DIM = 2, 8, 32
    HEADS, DIM_HEAD, MLP_DIM, DEPTH = 4, 8, 64, 2

    key = jax.random.PRNGKey(0)
    kx, kp = jax.random.split(key)
    x = jax.random.normal(kx, (B, N, DIM), jnp.float32)
    layers = init_params(kp, DEPTH, DIM, HEADS, DIM_HEAD, MLP_DIM)
    packed = pack_params(layers, HEADS, DIM_HEAD)

    out = transformer_forward(x, packed, heads=HEADS, dim_head=DIM_HEAD)
    out = jax.block_until_ready(out)

    ref = jax.block_until_ready(ref_forward(x, layers, HEADS, DIM_HEAD))
    assert out.shape == (B, N, DIM)
    err = float(jnp.max(jnp.abs(out - ref)))
    # bf16 MXU inputs + approx reciprocal -> relaxed (but still tight) tolerance.
    assert jnp.allclose(out, ref, rtol=2e-2, atol=2e-2), err

    print("KERNEL_OK")
</pallas_src>

<mosaic_0001>
module attributes {stable_mosaic.version = 11 : i64} {
  func.func @transformer_kernel(%arg0: i32, %arg1: i32, %arg2: memref<1x8x32xf32, #tpu.memory_space<vmem>>, %arg3: memref<1x32x1xf32, #tpu.memory_space<vmem>>, %arg4: memref<1x32x1xf32, #tpu.memory_space<vmem>>, %arg5: memref<1x96x32xbf16, #tpu.memory_space<vmem>>, %arg6: memref<1x32x32xbf16, #tpu.memory_space<vmem>>, %arg7: memref<1x32x1xf32, #tpu.memory_space<vmem>>, %arg8: memref<1x32x1xf32, #tpu.memory_space<vmem>>, %arg9: memref<1x32x1xf32, #tpu.memory_space<vmem>>, %arg10: memref<1x64x32xbf16, #tpu.memory_space<vmem>>, %arg11: memref<1x64x1xf32, #tpu.memory_space<vmem>>, %arg12: memref<1x32x64xbf16, #tpu.memory_space<vmem>>, %arg13: memref<1x32x1xf32, #tpu.memory_space<vmem>>, %arg14: memref<1x8x32xf32, #tpu.memory_space<vmem>>, %arg15: memref<32x8xf32, #tpu.memory_space<vmem>>) attributes {dimension_semantics = [#tpu.dimension_semantics<parallel>, #tpu.dimension_semantics<arbitrary>], iteration_bounds = array<i64: 2, 2>, scalar_prefetch = 0 : i64, scratch_operands = 1 : i64, tpu.core_type = #tpu.core_type<tc>, window_params = [{transform_indices = @transform_0, window_bounds = array<i64: 1, 8, 32>}, {transform_indices = @transform_1, window_bounds = array<i64: 1, 32, 1>}, {transform_indices = @transform_2, window_bounds = array<i64: 1, 32, 1>}, {transform_indices = @transform_3, window_bounds = array<i64: 1, 96, 32>}, {transform_indices = @transform_4, window_bounds = array<i64: 1, 32, 32>}, {transform_indices = @transform_5, window_bounds = array<i64: 1, 32, 1>}, {transform_indices = @transform_6, window_bounds = array<i64: 1, 32, 1>}, {transform_indices = @transform_7, window_bounds = array<i64: 1, 32, 1>}, {transform_indices = @transform_8, window_bounds = array<i64: 1, 64, 32>}, {transform_indices = @transform_9, window_bounds = array<i64: 1, 64, 1>}, {transform_indices = @transform_10, window_bounds = array<i64: 1, 32, 64>}, {transform_indices = @transform_11, window_bounds = array<i64: 1, 32, 1>}, {transform_indices = @transform_12, window_bounds = array<i64: 1, 8, 32>}]} {
    %c0_i32 = arith.constant 0 : i32
    %0 = arith.cmpi eq, %arg1, %c0_i32 : i32
    %1 = arith.extui %0 : i1 to i32
    %c0_i32_0 = arith.constant 0 : i32
    %2 = arith.cmpi ne, %1, %c0_i32_0 : i32
    scf.if %2 {
      %c0_58 = arith.constant 0 : index
      %c0_59 = arith.constant 0 : index
      %c0_60 = arith.constant 0 : index
      %124 = vector.load %arg2[%c0_58, %c0_59, %c0_60] : memref<1x8x32xf32, #tpu.memory_space<vmem>>, vector<1x8x32xf32>
      %125 = vector.shape_cast %124 : vector<1x8x32xf32> to vector<8x32xf32>
      %126 = tpu.transpose %125, [1, 0] : vector<8x32xf32> -> vector<32x8xf32>
      %c0_61 = arith.constant 0 : index
      %c0_62 = arith.constant 0 : index
      %127 = vector.load %arg15[%c0_61, %c0_62] : memref<32x8xf32, #tpu.memory_space<vmem>>, vector<32x8xf32>
      tpu.vector_store %arg15[%c0_61, %c0_62], %126 {strides = array<i32>} : memref<32x8xf32, #tpu.memory_space<vmem>>, vector<32x8xf32>,
    } else {
    }
    %c0 = arith.constant 0 : index
    %c0_1 = arith.constant 0 : index
    %3 = vector.load %arg15[%c0, %c0_1] : memref<32x8xf32, #tpu.memory_space<vmem>>, vector<32x8xf32>
    %c0_2 = arith.constant 0 : index
    %c0_3 = arith.constant 0 : index
    %c0_4 = arith.constant 0 : index
    %4 = vector.load %arg3[%c0_2, %c0_3, %c0_4] : memref<1x32x1xf32, #tpu.memory_space<vmem>>, vector<1x32x1xf32>
    %5 = vector.shape_cast %4 : vector<1x32x1xf32> to vector<32x1xf32>
    %c0_5 = arith.constant 0 : index
    %c0_6 = arith.constant 0 : index
    %c0_7 = arith.constant 0 : index
    %6 = vector.load %arg4[%c0_5, %c0_6, %c0_7] : memref<1x32x1xf32, #tpu.memory_space<vmem>>, vector<1x32x1xf32>
    %7 = vector.shape_cast %6 : vector<1x32x1xf32> to vector<32x1xf32>
    %cst = arith.constant dense<0.000000e+00> : vector<8xf32>
    %8 = vector.multi_reduction <add>, %3, %cst [0] : vector<32x8xf32> to vector<8xf32>
    %9 = vector.shape_cast %8 : vector<8xf32> to vector<1x8xf32>
    %cst_8 = arith.constant 3.200000e+01 : f32
    %10 = vector.broadcast %cst_8 : f32 to vector<1x8xf32>
    %11 = arith.divf %9, %10 : vector<1x8xf32>
    %12 = arith.mulf %3, %3 : vector<32x8xf32>
    %cst_9 = arith.constant dense<0.000000e+00> : vector<8xf32>
    %13 = vector.multi_reduction <add>, %12, %cst_9 [0] : vector<32x8xf32> to vector<8xf32>
    %14 = vector.shape_cast %13 : vector<8xf32> to vector<1x8xf32>
    %cst_10 = arith.constant 3.200000e+01 : f32
    %15 = vector.broadcast %cst_10 : f32 to vector<1x8xf32>
    %16 = arith.divf %14, %15 : vector<1x8xf32>
    %17 = arith.mulf %11, %11 : vector<1x8xf32>
    %18 = arith.subf %16, %17 : vector<1x8xf32>
    %19 = vector.broadcast %11 : vector<1x8xf32> to vector<32x8xf32>
    %20 = arith.subf %3, %19 : vector<32x8xf32>
    %cst_11 = arith.constant 9.99999974E-6 : f32
    %21 = vector.broadcast %cst_11 : f32 to vector<1x8xf32>
    %22 = arith.addf %18, %21 : vector<1x8xf32>
    %23 = math.rsqrt %22 : vector<1x8xf32>
    %24 = vector.broadcast %23 : vector<1x8xf32> to vector<32x8xf32>
    %25 = arith.mulf %20, %24 : vector<32x8xf32>
    %26 = vector.broadcast %5 : vector<32x1xf32> to vector<32x8xf32>
    %27 = arith.mulf %25, %26 : vector<32x8xf32>
    %28 = vector.broadcast %7 : vector<32x1xf32> to vector<32x8xf32>
    %29 = arith.addf %27, %28 : vector<32x8xf32>
    %30 = arith.truncf %29 : vector<32x8xf32> to vector<32x8xbf16>
    %c0_12 = arith.constant 0 : index
    %c0_13 = arith.constant 0 : index
    %c0_14 = arith.constant 0 : index
    %31 = vector.load %arg5[%c0_12, %c0_13, %c0_14] : memref<1x96x32xbf16, #tpu.memory_space<vmem>>, vector<1x96x32xbf16>
    %32 = vector.shape_cast %31 : vector<1x96x32xbf16> to vector<96x32xbf16>
    %cst_15 = arith.constant dense<0.000000e+00> : vector<96x8xf32>
    %33 = tpu.matmul %32, %30, %cst_15 {dimension_numbers = #tpu.dot_dimension_numbers<[1], [0], [0], [1], [0, 0, 1, 1], [], []>} : vector<96x32xbf16>, vector<32x8xbf16>, vector<96x8xf32> -> vector<96x8xf32>
    %34 = vector.shape_cast %33 : vector<96x8xf32> to vector<3x4x8x8xf32>
    %35 = vector.extract_strided_slice %34 {offsets = [0, 0, 0, 0], sizes = [1, 4, 8, 8], strides = [1, 1, 1, 1]} : vector<3x4x8x8xf32> to vector<1x4x8x8xf32>
    %36 = vector.shape_cast %35 : vector<1x4x8x8xf32> to vector<4x8x8xf32>
    %37 = vector.extract_strided_slice %34 {offsets = [1, 0, 0, 0], sizes = [1, 4, 8, 8], strides = [1, 1, 1, 1]} : vector<3x4x8x8xf32> to vector<1x4x8x8xf32>
    %38 = vector.shape_cast %37 : vector<1x4x8x8xf32> to vector<4x8x8xf32>
    %39 = vector.extract_strided_slice %34 {offsets = [2, 0, 0, 0], sizes = [1, 4, 8, 8], strides = [1, 1, 1, 1]} : vector<3x4x8x8xf32> to vector<1x4x8x8xf32>
    %40 = vector.shape_cast %39 : vector<1x4x8x8xf32> to vector<4x8x8xf32>
    %41 = tpu.transpose %36, [0, 2, 1] : vector<4x8x8xf32> -> vector<4x8x8xf32>
    %42 = arith.truncf %41 : vector<4x8x8xf32> to vector<4x8x8xbf16>
    %43 = arith.truncf %38 : vector<4x8x8xf32> to vector<4x8x8xbf16>
    %cst_16 = arith.constant dense<0.000000e+00> : vector<4x8x8xf32>
    %44 = tpu.matmul %42, %43, %cst_16 {dimension_numbers = #tpu.dot_dimension_numbers<[2], [1], [1], [2], [0, 0, 0, 1, 1, 2], [0], [0]>} : vector<4x8x8xbf16>, vector<4x8x8xbf16>, vector<4x8x8xf32> -> vector<4x8x8xf32>
    %cst_17 = arith.constant dense<0xFF800000> : vector<4x8xf32>
    %45 = vector.multi_reduction <maximumf>, %44, %cst_17 [2] : vector<4x8x8xf32> to vector<4x8xf32>
    %46 = vector.shape_cast %45 : vector<4x8xf32> to vector<4x8x1xf32>
    %47 = vector.broadcast %46 : vector<4x8x1xf32> to vector<4x8x8xf32>
    %48 = arith.subf %44, %47 : vector<4x8x8xf32>
    %49 = math.exp %48 : vector<4x8x8xf32>
    %cst_18 = arith.constant dense<0.000000e+00> : vector<4x8xf32>
    %50 = vector.multi_reduction <add>, %49, %cst_18 [2] : vector<4x8x8xf32> to vector<4x8xf32>
    %51 = vector.shape_cast %50 : vector<4x8xf32> to vector<4x8x1xf32>
    %52 = tpu.reciprocal %51 {approx = true} : vector<4x8x1xf32> -> vector<4x8x1xf32>
    %53 = vector.broadcast %52 : vector<4x8x1xf32> to vector<4x8x8xf32>
    %54 = arith.mulf %49, %53 : vector<4x8x8xf32>
    %55 = tpu.transpose %54, [0, 2, 1] : vector<4x8x8xf32> -> vector<4x8x8xf32>
    %56 = arith.truncf %55 : vector<4x8x8xf32> to vector<4x8x8xbf16>
    %57 = arith.truncf %40 : vector<4x8x8xf32> to vector<4x8x8xbf16>
    %cst_19 = arith.constant dense<0.000000e+00> : vector<4x8x8xf32>
    %58 = tpu.matmul %57, %56, %cst_19 {dimension_numbers = #tpu.dot_dimension_numbers<[2], [1], [1], [2], [0, 0, 0, 1, 1, 2], [0], [0]>} : vector<4x8x8xbf16>, vector<4x8x8xbf16>, vector<4x8x8xf32> -> vector<4x8x8xf32>
    %59 = vector.shape_cast %58 : vector<4x8x8xf32> to vector<32x8xf32>
    %60 = arith.truncf %59 : vector<32x8xf32> to vector<32x8xbf16>
    %c0_20 = arith.constant 0 : index
    %c0_21 = arith.constant 0 : index
    %c0_22 = arith.constant 0 : index
    %61 = vector.load %arg6[%c0_20, %c0_21, %c0_22] : memref<1x32x32xbf16, #tpu.memory_space<vmem>>, vector<1x32x32xbf16>
    %62 = vector.shape_cast %61 : vector<1x32x32xbf16> to vector<32x32xbf16>
    %cst_23 = arith.constant dense<0.000000e+00> : vector<32x8xf32>
    %63 = tpu.matmul %62, %60, %cst_23 {dimension_numbers = #tpu.dot_dimension_numbers<[1], [0], [0], [1], [0, 0, 1, 1], [], []>} : vector<32x32xbf16>, vector<32x8xbf16>, vector<32x8xf32> -> vector<32x8xf32>
    %64 = arith.addf %3, %63 : vector<32x8xf32>
    %c0_24 = arith.constant 0 : index
    %c0_25 = arith.constant 0 : index
    %c0_26 = arith.constant 0 : index
    %65 = vector.load %arg7[%c0_24, %c0_25, %c0_26] : memref<1x32x1xf32, #tpu.memory_space<vmem>>, vector<1x32x1xf32>
    %66 = vector.shape_cast %65 : vector<1x32x1xf32> to vector<32x1xf32>
    %67 = vector.broadcast %66 : vector<32x1xf32> to vector<32x8xf32>
    %68 = arith.addf %64, %67 : vector<32x8xf32>
    %c0_27 = arith.constant 0 : index
    %c0_28 = arith.constant 0 : index
    %c0_29 = arith.constant 0 : index
    %69 = vector.load %arg8[%c0_27, %c0_28, %c0_29] : memref<1x32x1xf32, #tpu.memory_space<vmem>>, vector<1x32x1xf32>
    %70 = vector.shape_cast %69 : vector<1x32x1xf32> to vector<32x1xf32>
    %c0_30 = arith.constant 0 : index
    %c0_31 = arith.constant 0 : index
    %c0_32 = arith.constant 0 : index
    %71 = vector.load %arg9[%c0_30, %c0_31, %c0_32] : memref<1x32x1xf32, #tpu.memory_space<vmem>>, vector<1x32x1xf32>
    %72 = vector.shape_cast %71 : vector<1x32x1xf32> to vector<32x1xf32>
    %cst_33 = arith.constant dense<0.000000e+00> : vector<8xf32>
    %73 = vector.multi_reduction <add>, %68, %cst_33 [0] : vector<32x8xf32> to vector<8xf32>
    %74 = vector.shape_cast %73 : vector<8xf32> to vector<1x8xf32>
    %cst_34 = arith.constant 3.200000e+01 : f32
    %75 = vector.broadcast %cst_34 : f32 to vector<1x8xf32>
    %76 = arith.divf %74, %75 : vector<1x8xf32>
    %77 = arith.mulf %68, %68 : vector<32x8xf32>
    %cst_35 = arith.constant dense<0.000000e+00> : vector<8xf32>
    %78 = vector.multi_reduction <add>, %77, %cst_35 [0] : vector<32x8xf32> to vector<8xf32>
    %79 = vector.shape_cast %78 : vector<8xf32> to vector<1x8xf32>
    %cst_36 = arith.constant 3.200000e+01 : f32
    %80 = vector.broadcast %cst_36 : f32 to vector<1x8xf32>
    %81 = arith.divf %79, %80 : vector<1x8xf32>
    %82 = arith.mulf %76, %76 : vector<1x8xf32>
    %83 = arith.subf %81, %82 : vector<1x8xf32>
    %84 = vector.broadcast %76 : vector<1x8xf32> to vector<32x8xf32>
    %85 = arith.subf %68, %84 : vector<32x8xf32>
    %cst_37 = arith.constant 9.99999974E-6 : f32
    %86 = vector.broadcast %cst_37 : f32 to vector<1x8xf32>
    %87 = arith.addf %83, %86 : vector<1x8xf32>
    %88 = math.rsqrt %87 : vector<1x8xf32>
    %89 = vector.broadcast %88 : vector<1x8xf32> to vector<32x8xf32>
    %90 = arith.mulf %85, %89 : vector<32x8xf32>
    %91 = vector.broadcast %70 : vector<32x1xf32> to vector<32x8xf32>
    %92 = arith.mulf %90, %91 : vector<32x8xf32>
    %93 = vector.broadcast %72 : vector<32x1xf32> to vector<32x8xf32>
    %94 = arith.addf %92, %93 : vector<32x8xf32>
    %95 = arith.truncf %94 : vector<32x8xf32> to vector<32x8xbf16>
    %c0_38 = arith.constant 0 : index
    %c0_39 = arith.constant 0 : index
    %c0_40 = arith.constant 0 : index
    %96 = vector.load %arg10[%c0_38, %c0_39, %c0_40] : memref<1x64x32xbf16, #tpu.memory_space<vmem>>, vector<1x64x32xbf16>
    %97 = vector.shape_cast %96 : vector<1x64x32xbf16> to vector<64x32xbf16>
    %cst_41 = arith.constant dense<0.000000e+00> : vector<64x8xf32>
    %98 = tpu.matmul %97, %95, %cst_41 {dimension_numbers = #tpu.dot_dimension_numbers<[1], [0], [0], [1], [0, 0, 1, 1], [], []>} : vector<64x32xbf16>, vector<32x8xbf16>, vector<64x8xf32> -> vector<64x8xf32>
    %c0_42 = arith.constant 0 : index
    %c0_43 = arith.constant 0 : index
    %c0_44 = arith.constant 0 : index
    %99 = vector.load %arg11[%c0_42, %c0_43, %c0_44] : memref<1x64x1xf32, #tpu.memory_space<vmem>>, vector<1x64x1xf32>
    %100 = vector.shape_cast %99 : vector<1x64x1xf32> to vector<64x1xf32>
    %101 = vector.broadcast %100 : vector<64x1xf32> to vector<64x8xf32>
    %102 = arith.addf %98, %101 : vector<64x8xf32>
    %cst_45 = arith.constant 5.000000e-01 : f32
    %103 = vector.broadcast %cst_45 : f32 to vector<64x8xf32>
    %104 = arith.mulf %103, %102 : vector<64x8xf32>
    %cst_46 = arith.constant 0.707106769 : f32
    %105 = vector.broadcast %cst_46 : f32 to vector<64x8xf32>
    %106 = arith.mulf %102, %105 : vector<64x8xf32>
    %107 = math.erf %106 : vector<64x8xf32>
    %cst_47 = arith.constant 1.000000e+00 : f32
    %108 = vector.broadcast %cst_47 : f32 to vector<64x8xf32>
    %109 = arith.addf %108, %107 : vector<64x8xf32>
    %110 = arith.mulf %104, %109 : vector<64x8xf32>
    %111 = arith.truncf %110 : vector<64x8xf32> to vector<64x8xbf16>
    %c0_48 = arith.constant 0 : index
    %c0_49 = arith.constant 0 : index
    %c0_50 = arith.constant 0 : index
    %112 = vector.load %arg12[%c0_48, %c0_49, %c0_50] : memref<1x32x64xbf16, #tpu.memory_space<vmem>>, vector<1x32x64xbf16>
    %113 = vector.shape_cast %112 : vector<1x32x64xbf16> to vector<32x64xbf16>
    %cst_51 = arith.constant dense<0.000000e+00> : vector<32x8xf32>
    %114 = tpu.matmul %113, %111, %cst_51 {dimension_numbers = #tpu.dot_dimension_numbers<[1], [0], [0], [1], [0, 0, 1, 1], [], []>} : vector<32x64xbf16>, vector<64x8xbf16>, vector<32x8xf32> -> vector<32x8xf32>
    %115 = arith.addf %68, %114 : vector<32x8xf32>
    %c0_52 = arith.constant 0 : index
    %c0_53 = arith.constant 0 : index
    %c0_54 = arith.constant 0 : index
    %116 = vector.load %arg13[%c0_52, %c0_53, %c0_54] : memref<1x32x1xf32, #tpu.memory_space<vmem>>, vector<1x32x1xf32>
    %117 = vector.shape_cast %116 : vector<1x32x1xf32> to vector<32x1xf32>
    %118 = vector.broadcast %117 : vector<32x1xf32> to vector<32x8xf32>
    %119 = arith.addf %115, %118 : vector<32x8xf32>
    %c0_55 = arith.constant 0 : index
    %c0_56 = arith.constant 0 : index
    %120 = vector.load %arg15[%c0_55, %c0_56] : memref<32x8xf32, #tpu.memory_space<vmem>>, vector<32x8xf32>
    tpu.vector_store %arg15[%c0_55, %c0_56], %119 {strides = array<i32>} : memref<32x8xf32, #tpu.memory_space<vmem>>, vector<32x8xf32>,
    %c1_i32 = arith.constant 1 : i32
    %121 = arith.cmpi eq, %arg1, %c1_i32 : i32
    %122 = arith.extui %121 : i1 to i32
    %c0_i32_57 = arith.constant 0 : i32
    %123 = arith.cmpi ne, %122, %c0_i32_57 : i32
    scf.if %123 {
      %124 = tpu.transpose %119, [1, 0] : vector<32x8xf32> -> vector<8x32xf32>
      %c0_58 = arith.constant 0 : index
      %c0_59 = arith.constant 0 : index
      %c0_60 = arith.constant 0 : index
      %125 = vector.load %arg14[%c0_58, %c0_59, %c0_60] : memref<1x8x32xf32, #tpu.memory_space<vmem>>, vector<1x8x32xf32>
      %126 = vector.shape_cast %125 : vector<1x8x32xf32> to vector<8x32xf32>
      %127 = vector.shape_cast %124 : vector<8x32xf32> to vector<1x8x32xf32>
      tpu.vector_store %arg14[%c0_58, %c0_59, %c0_60], %127 {strides = array<i32>} : memref<1x8x32xf32, #tpu.memory_space<vmem>>, vector<1x8x32xf32>,
    } else {
    }
    return
  }
  func.func @transform_0(%arg0: i32, %arg1: i32) -> (i32, i32, i32) {
    %c0_i32 = arith.constant 0 : i32
    %c0_i32_0 = arith.constant 0 : i32
    %c0_i32_1 = arith.constant 0 : i32
    return %arg0, %c0_i32, %c0_i32_0 : i32, i32, i32
  }
  func.func @transform_1(%arg0: i32, %arg1: i32) -> (i32, i32, i32) {
    %c0_i32 = arith.constant 0 : i32
    %c0_i32_0 = arith.constant 0 : i32
    %c0_i32_1 = arith.constant 0 : i32
    return %arg1, %c0_i32, %c0_i32_0 : i32, i32, i32
  }
  func.func @transform_2(%arg0: i32, %arg1: i32) -> (i32, i32, i32) {
    %c0_i32 = arith.constant 0 : i32
    %c0_i32_0 = arith.constant 0 : i32
    %c0_i32_1 = arith.constant 0 : i32
    return %arg1, %c0_i32, %c0_i32_0 : i32, i32, i32
  }
  func.func @transform_3(%arg0: i32, %arg1: i32) -> (i32, i32, i32) {
    %c0_i32 = arith.constant 0 : i32
    %c0_i32_0 = arith.constant 0 : i32
    %c0_i32_1 = arith.constant 0 : i32
    return %arg1, %c0_i32, %c0_i32_0 : i32, i32, i32
  }
  func.func @transform_4(%arg0: i32, %arg1: i32) -> (i32, i32, i32) {
    %c0_i32 = arith.constant 0 : i32
    %c0_i32_0 = arith.constant 0 : i32
    %c0_i32_1 = arith.constant 0 : i32
    return %arg1, %c0_i32, %c0_i32_0 : i32, i32, i32
  }
  func.func @transform_5(%arg0: i32, %arg1: i32) -> (i32, i32, i32) {
    %c0_i32 = arith.constant 0 : i32
    %c0_i32_0 = arith.constant 0 : i32
    %c0_i32_1 = arith.constant 0 : i32
    return %arg1, %c0_i32, %c0_i32_0 : i32, i32, i32
  }
  func.func @transform_6(%arg0: i32, %arg1: i32) -> (i32, i32, i32) {
    %c0_i32 = arith.constant 0 : i32
    %c0_i32_0 = arith.constant 0 : i32
    %c0_i32_1 = arith.constant 0 : i32
    return %arg1, %c0_i32, %c0_i32_0 : i32, i32, i32
  }
  func.func @transform_7(%arg0: i32, %arg1: i32) -> (i32, i32, i32) {
    %c0_i32 = arith.constant 0 : i32
    %c0_i32_0 = arith.constant 0 : i32
    %c0_i32_1 = arith.constant 0 : i32
    return %arg1, %c0_i32, %c0_i32_0 : i32, i32, i32
  }
  func.func @transform_8(%arg0: i32, %arg1: i32) -> (i32, i32, i32) {
    %c0_i32 = arith.constant 0 : i32
    %c0_i32_0 = arith.constant 0 : i32
    %c0_i32_1 = arith.constant 0 : i32
    return %arg1, %c0_i32, %c0_i32_0 : i32, i32, i32
  }
  func.func @transform_9(%arg0: i32, %arg1: i32) -> (i32, i32, i32) {
    %c0_i32 = arith.constant 0 : i32
    %c0_i32_0 = arith.constant 0 : i32
    %c0_i32_1 = arith.constant 0 : i32
    return %arg1, %c0_i32, %c0_i32_0 : i32, i32, i32
  }
  func.func @transform_10(%arg0: i32, %arg1: i32) -> (i32, i32, i32) {
    %c0_i32 = arith.constant 0 : i32
    %c0_i32_0 = arith.constant 0 : i32
    %c0_i32_1 = arith.constant 0 : i32
    return %arg1, %c0_i32, %c0_i32_0 : i32, i32, i32
  }
  func.func @transform_11(%arg0: i32, %arg1: i32) -> (i32, i32, i32) {
    %c0_i32 = arith.constant 0 : i32
    %c0_i32_0 = arith.constant 0 : i32
    %c0_i32_1 = arith.constant 0 : i32
    return %arg1, %c0_i32, %c0_i32_0 : i32, i32, i32
  }
  func.func @transform_12(%arg0: i32, %arg1: i32) -> (i32, i32, i32) {
    %c0_i32 = arith.constant 0 : i32
    %c0_i32_0 = arith.constant 0 : i32
    %c0_i32_1 = arith.constant 0 : i32
    return %arg0, %c0_i32, %c0_i32_0 : i32, i32, i32
  }
}

</mosaic_0001>

<bundles_post_ra>
// kernel: tpu_custom_call.1
= control target key start
LH: loop header
LB: loop body
LE: loop exit
PB: predicated region body
PF: predicated region fallthrough
CT: control target
= control target key end

     0   :  { %s3301_s0 = inlined_call_operand.vmem [shape: f32[2,8,32], index: 0, kind: input, shape index: {}]   ;;  %s3302_s1 = inlined_call_operand.vmem [shape: f32[2,32,1], index: 1, kind: input, shape index: {}]   ;;  %s3303_s2 = inlined_call_operand.vmem [shape: f32[2,32,1], index: 2, kind: input, shape index: {}]   ;;  %s3304_s3 = inlined_call_operand.vmem [shape: bf16[2,96,32], index: 3, kind: input, shape index: {}]   ;;  %s3305_s4 = inlined_call_operand.vmem [shape: bf16[2,32,32], index: 4, kind: input, shape index: {}]   ;;  %s3306_s5 = inlined_call_operand.vmem [shape: f32[2,32,1], index: 5, kind: input, shape index: {}]   ;;  %s3307_s6 = inlined_call_operand.vmem [shape: f32[2,32,1], index: 6, kind: input, shape index: {}]   ;;  %s3308_s7 = inlined_call_operand.vmem [shape: f32[2,32,1], index: 7, kind: input, shape index: {}]   ;;  %s3309_s8 = inlined_call_operand.vmem [shape: bf16[2,64,32], index: 8, kind: input, shape index: {}]   ;;  %s3310_s9 = inlined_call_operand.vmem [shape: f32[2,64,1], index: 9, kind: input, shape index: {}]   ;;  %s3311_s10 = inlined_call_operand.vmem [shape: bf16[2,32,64], index: 10, kind: input, shape index: {}]   ;;  %s3312_s11 = inlined_call_operand.vmem [shape: f32[2,32,1], index: 11, kind: input, shape index: {}]   ;;  %s3313_s12 = inlined_call_operand.hbm [shape: f32[2,8,32], index: 12, kind: output, shape index: {}]  }
   0x1   :  { %3329 = sst [smem:[#allocation19_spill]] %s3301_s0 }
   0x2   :  { %3330 = sst [smem:[#allocation20_spill]] %s3302_s1 }
   0x3   :  { %3331 = sst [smem:[#allocation21_spill]] %s3303_s2 }
   0x4   :  { %3332 = sst [smem:[#allocation22_spill]] %s3304_s3 }
   0x5   :  { %3333 = sst [smem:[#allocation23_spill]] %s3305_s4 }
   0x6   :  { %3334 = sst [smem:[#allocation24_spill]] %s3306_s5 }
   0x7   :  { %3335 = sst [smem:[#allocation25_spill]] %s3307_s6 }
   0x8   :  { %3336 = sst [smem:[#allocation26_spill]] %s3313_s12 }
   0x9   :  { %17 = vsyncpa [#allocation4], 0 }
   0xa   :  { %19 = vsyncpa [#allocation4 + $0x1], 0  ;;  %s2904_s21 = smov 0   ;;  %s2906_s22 = smov 0  }
   0xb   :  { %s2908_s23 = smov 0   ;;  %s2910_s24 = smov 0  }
   0xc   :  { %s2912_s25 = smov 0   ;;  %s2914_s26 = smov 0  }
   0xd   :  { %s2916_s27 = smov 0   ;;  %s2918_s28 = smov 0  }
   0xe LB: > { %3337 = sst [smem:[#allocation6_spill]] %s2805_s21  ;;  %s2380_s29 = sadd.s32 4294967295, %s2833_s28   ;;  %s2833_s28 = sphi %s2918_s28, %s25_s28   ;;  %s2829_s27 = sphi %s2916_s27, %s3374_s27   ;;  %s2825_s26 = sphi %s2914_s26, %s3373_s26   ;;  %s2821_s25 = sphi %s2912_s25, %s3372_s25   ;;  %s2817_s24 = sphi %s2910_s24, %s3371_s24   ;;  %s2813_s23 = sphi %s2908_s23, %s3370_s23   ;;  %s2809_s22 = sphi %s2906_s22, %s3369_s22   ;;  %s2805_s21 = sphi %s2904_s21, %s3368_s21  }
   0xf   : > { %3338 = sst [smem:[#allocation7_spill]] %s2809_s22  ;;  %s2381_s30 = sadd.s32 4294967294, %s2833_s28  }
  0x10   : > { %3339 = sst [smem:[#allocation8_spill]] %s2813_s23  ;;  %s34_s13 = sadd.s32 1, %s2825_s26 }
  0x11   : > { %3340 = sst [smem:[#allocation9_spill]] %s2821_s25  ;;  %p35_p0 = scmp.ge.s32.totalorder %s34_s13, 2 }
  0x12   : > { %3341 = sst [smem:[#allocation10_spill]] %s2825_s26  ;;  %s37_s14 = sadd.s32 1, %s2829_s27 }
  0x13   : > { %3342 = sst [smem:[#allocation11_spill]] %s2829_s27  ;;  %p366_p1 = scmp.ne.s32.totalorder %s2813_s23, %s2809_s22 }
  0x14   : > { %3343 = sst [smem:[#allocation12_spill]] %s2833_s28  ;;  %p367_p2 = scmp.eq.s32.totalorder %s2380_s29, 3 }
  0x15   : > { %s3376_s13 = smov (%p35_p0, %s34_s13), 0  ;;  %s3378_s14 = smov (!%p35_p0, %s37_s14), %s2829_s27 }
  0x16   : > { %3344 = sst [smem:[#allocation13_spill]] %s3376_s13  ;;  %p2953_p3 = por %p367_p2, %p366_p1 }
  0x17   : > { %p372_p4 = scmp.ne.s32.totalorder %s2809_s22, %s2805_s21  ;;  %p39_p5 = scmp.ge.s32.totalorder %s3378_s14, 2 }
  0x18   : > { %s3345_s15 = scalar_select %p2953_p3, 1, 0 }
  0x19   : > { %p373_p6 = scmp.eq.s32.totalorder %s2381_s30, 3  ;;  %p2384_p7 = scmp.ge.s32.totalorder %s2833_s28, 1 }
  0x1a   : > { %3346 = sst [smem:[#allocation14_spill]] %s3345_s15  ;;  %p486_p8 = scmp.lt.s32.totalorder %s2833_s28, 5 }
  0x1b   : > { %s3380_s14 = smov (%p39_p5, %s3378_s14), 0  ;;  %p2963_p9 = por %p373_p6, %p372_p4 }
  0x1c   : > { %3347 = sst [smem:[#allocation15_spill]] %s3380_s14  ;;  %p487_p10 = pnand %p2384_p7, %p486_p8 }
  0x1d   : > { %s3348_s16 = scalar_select %p2963_p9, 1, 0 }
  0x1e   : > { %s353_s17 = ssub.s32 %s2829_s27, %s3380_s14  ;;  %s356_s18 = sadd.s32 1, %s2813_s23 }
  0x1f   : > { %3349 = sst [smem:[#allocation16_spill]] %s3348_s16  ;;  %p354_p11 = scmp.eq.s32.totalorder %s353_s17, 0 }
  0x20   : > { %490 = sbr.rel (%p487_p10) target bundleno = 2504 (0x9c8), region = 68 }
  0x21   : > { %s2971_s19 = scalar_select %p354_p11, %s2813_s23, %s356_s18  }
  0x23   : > { %3350 = sst [smem:[#allocation17_spill]] %s2971_s19 }
  0x27   : > { %s3322_s20 = sand.u32 1, %s2809_s22   ;;  %p582_p12 = scmp.lt.s32.totalorder %s2821_s25, 1 }
  0x28   : > { %s2977_s29 = sshll.u32 %s3322_s20, 3  ;;  %p586_p13 = scmp.lt.s32.totalorder %s2817_s24, 1 }
  0x29   : > { %s583_s30 = scalar_select %p582_p12, %s2821_s25, 1 }
  0x2a   : > { %s587_s13 = scalar_select %p586_p13, %s2817_s24, 1 }
  0x2b   : > { %s2386_s14 = sshll.u32 %s583_s30, 3  ;;  %s3351_s0 = sld [smem:[#allocation19_spill]] }
  0x2c   : > { %s2450_s26 = sshll.u32 %s587_s13, 5  ;;  %s3352_s1 = sld [smem:[#allocation20_spill]] }
  0x2d   : > { %s3354_s2 = sld [smem:[#allocation21_spill]]  ;;  %s2596_s12 = smul.u32 48, %s587_s13 }
  0x2e   : > { %s2452_s15 = sshll.u32 %s587_s13, 4  ;;  %s3355_s4 = sld [smem:[#allocation23_spill]] }
  0x2f   : > { %s3356_s5 = sld [smem:[#allocation24_spill]]  ;;  %s3357_s3 = sld [smem:[#allocation22_spill]] }
  0x30   : > { %s3358_s6 = sld [smem:[#allocation25_spill]]  ;;  %s3018_s22 = scalar_lea.vmem %s3308_s7, %s2450_s26 }
  0x31   : > { %s585_s18 = scalar_lea.vmem %s3351_s0, %s2386_s14  ;;  %s3023_s27 = scalar_lea.vmem %s3309_s8, %s2450_s26 }
  0x32   : > { %s2988_s16 = scalar_lea.vmem %s3352_s1, %s2450_s26  ;;  %s2457_s14 = sshll.u32 %s587_s13, 6 }
  0x33   : > { %3353 = sst [smem:[#allocation18_spill]] %s2988_s16  ;;  %s2993_s20 = scalar_lea.vmem %s3354_s2, %s2450_s26 }
  0x34   : > { %s2998_s25 = scalar_lea.vmem %s3355_s4, %s2452_s15  ;;  %s3033_s28 = scalar_lea.vmem %s3310_s9, %s2457_s14 }
  0x35   : > { %s3003_s17 = scalar_lea.vmem %s3356_s5, %s2450_s26  ;;  %s3008_s0 = scalar_lea.vmem %s3357_s3, %s2596_s12 }
  0x36   : > { %s3013_s1 = scalar_lea.vmem %s3358_s6, %s2450_s26  ;;  %s3028_s12 = scalar_lea.vmem %s3311_s10, %s2452_s15 }
  0x37   : > { %s3038_s16 = scalar_lea.vmem %s3312_s11, %s2450_s26  ;;  %s581_s6 = scalar_lea.vmem [#allocation3], %s2977_s29 }
  0x38   : > { %p2408_p0 = scmp.ne.s32.totalorder %s2817_s24, 0 }
  0x39   : > { %v646_v0 = vld [vmem:[%s585_s18] sm:$0xff] (!%p2408_p0)  ;;  %vm679_vm0 = vcmask (!%p2408_p0), 64512  }
  0x3a   : > { %645 = sbr.rel (%p2408_p0) target bundleno = 200 (0xc8), region = 72  ;;  %647 = vxpose.xlu0.b32.start.end [1/1] (short) (narrow) (!%p2408_p0), %v646_v0, 32 }
  0xba   : > { %v663_v1 = vpop.trf.xlu0 }
  0xbb   : > { %680 = vst.msk [vmem:[#allocation2] sm:$0xff] %vm679_vm0, %v663_v1 }
  0xbe   : > { %v664_v2 = vpop.trf.xlu0 }
  0xbf   : > { %681 = vst.msk [vmem:[#allocation2 + $0x8] sm:$0xff] %vm679_vm0, %v664_v2 }
  0xc2   : > { %v665_v3 = vpop.trf.xlu0 }
  0xc3   : > { %682 = vst.msk [vmem:[#allocation2 + $0x10] sm:$0xff] %vm679_vm0, %v665_v3 }
  0xc6   : > { %v666_v4 = vpop.trf.xlu0 }
  0xc7   : > { %683 = vst.msk [vmem:[#allocation2 + $0x18] sm:$0xff] %vm679_vm0, %v666_v4 }
  0xc8 PF: > { %s3359_s3 = sld [smem:[#allocation18_spill]]  ;;  %v692_v5 = vld [vmem:[%s2993_s20] sm:$0xff]  ;;  %v2835_v7 = vmov 0   ;;  %v693_v8 = vld [vmem:[%s2993_s20 + $0x8] sm:$0xff]  ;;  %v695_v12 = vld [vmem:[%s2993_s20 + $0x18] sm:$0xff]  ;;  %vm834_vm1 = vcmask 261120  }
  0xc9   : > { %2674 = vset.pattern.permute.xlu1 %v2835_v7  ;;  %2673 = vset.pattern.permute.xlu0 %v2835_v7  ;;  %v694_v13 = vld [vmem:[%s2993_s20 + $0x10] sm:$0xff]  ;;  %v2689_v14 = vld [vmem:[%s3008_s0] sm:$0xff]   ;;  %vm696_vm2 = vcmask 64512   ;;  %v3054_v16 = vld [vmem:[#allocation2 + $0x8] sm:$0xff]  ;;  %vm2837_vm3 = vmmov 0   ;;  %vm1073_vm4 = vcmask 1043456  }
  0xca   : > { %768 = vperm.xlu1 %2674, %v692_v5   ;;  %2504 = vmatprep.mubr.msk.bf16.mxu0 %vm834_vm1, %v2689_v14  ;;  %v3052_v15 = vld [vmem:[#allocation2] sm:$0xff]  ;;  %v698_v18 = vsel %vm696_vm2, %v3054_v16, 0.0  ;;  %v713_v20 = vmul.f32 %v3054_v16, %v3054_v16  ;;  %v3064_v21 = vld [vmem:[#allocation2 + $0x10] sm:$0xff]  ;;  %vm2035_vm5 = vcmask 523264   ;;  %p2445_p1 = scmp.ne.s32.totalorder %s2817_s24, 1 }
  0xcb   : > { %v697_v17 = vsel %vm696_vm2, %v3052_v15, 0.0  ;;  %v712_v19 = vmul.f32 %v3052_v15, %v3052_v15  ;;  %v700_v23 = vsel %vm696_vm2, %v3064_v21, 0.0  ;;  %v714_v24 = vmul.f32 %v3064_v21, %v3064_v21 }
  0xcc   : > { %v699_v22 = vadd.f32 %v698_v18, %v697_v17  ;;  %v717_v26 = vsel %vm696_vm2, %v713_v20, 0.0  ;;  %v2691_v20 = vld [vmem:[%s3008_s0 + $0x10] sm:$0xff]  }
  0xcd   : > { %v716_v25 = vsel %vm696_vm2, %v712_v19, 0.0  ;;  %v719_v32 = vsel %vm696_vm2, %v714_v24, 0.0  ;;  %v2690_v19 = vld [vmem:[%s3008_s0 + $0x8] sm:$0xff]  }
  0xce   : > { %v688_v6 = vld [vmem:[%s3359_s3] sm:$0xff]  ;;  %v689_v9 = vld [vmem:[%s3359_s3 + $0x8] sm:$0xff]  ;;  %773 = vperm.xlu1 %2674, %v693_v8   ;;  %v691_v10 = vld [vmem:[%s3359_s3 + $0x18] sm:$0xff]  ;;  %v701_v28 = vadd.f32 %v700_v23, %v699_v22  ;;  %v718_v29 = vadd.f32 %v717_v26, %v716_v25  ;;  %v2836_v23 = vmov 0.0  }
  0xcf   : > { %744 = vperm.xlu0 %2673, %v688_v6   ;;  %v690_v11 = vld [vmem:[%s3359_s3 + $0x10] sm:$0xff]  ;;  %v3072_v27 = vld [vmem:[#allocation2 + $0x18] sm:$0xff]  ;;  %2516 = vmatprep.subr.bf16.mxu1 %v2836_v23 }
  0xd0   : > { %v702_v30 = vsel %vm696_vm2, %v3072_v27, 0.0  ;;  %v715_v31 = vmul.f32 %v3072_v27, %v3072_v27  ;;  %v720_v34 = vadd.f32 %v719_v32, %v718_v29  ;;  %v2692_v22 = vld [vmem:[%s3008_s0 + $0x18] sm:$0xff]   ;;  %2518 = vmatprep.mubr.msk.bf16.mxu1 %vm2837_vm3, %v2836_v23 }
  0xd1   : > { %v703_v33 = vadd.f32 %v702_v30, %v701_v28 }
  0xd2   : > { %759 = vperm.xlu1 %2674, %v691_v10   ;;  %v721_v35 = vsel %vm696_vm2, %v715_v31, 0.0 }
  0xd3   : > { %749 = vperm.xlu0 %2673, %v689_v9   ;;  %v704_v36 = vrot.slane %v703_v33, 4  ;;  %v722_v37 = vadd.f32 %v721_v35, %v720_v34 }
  0xd5   : > { %v705_v38 = vadd.f32 %v704_v36, %v703_v33  ;;  %v723_v39 = vrot.slane %v722_v37, 4 }
  0xd6   : > { %783 = vperm.xlu1 %2674, %v695_v12  }
  0xd7   : > { %754 = vperm.xlu0 %2673, %v690_v11   ;;  %v706_v40 = vrot.slane %v705_v38, 2  ;;  %v724_v41 = vadd.f32 %v723_v39, %v722_v37 }
  0xd9   : > { %v707_v42 = vadd.f32 %v706_v40, %v705_v38  ;;  %v725_v43 = vrot.slane %v724_v41, 2 }
  0xdb   : > { %778 = vperm.xlu0 %2673, %v694_v13   ;;  %v708_v44 = vrot.slane %v707_v42, 1  ;;  %v726_v45 = vadd.f32 %v725_v43, %v724_v41 }
  0xdd   : > { %v709_v46 = vadd.f32 %v708_v44, %v707_v42  ;;  %v727_v47 = vrot.slane %v726_v45, 1 }
  0xdf   : > { %v711_v48 = vmul.f32 0.03125, %v709_v46  ;;  %v728_v49 = vadd.f32 %v727_v47, %v726_v45 }
  0xe1   : > { %v729_v50 = vmul.f32 0.03125, %v728_v49  ;;  %v730_v51 = vmul.f32 %v711_v48, %v711_v48  ;;  %v732_v54 = vsub.f32 %v3052_v15, %v711_v48  ;;  %v733_v56 = vsub.f32 %v3054_v16, %v711_v48 }
  0xe2   : > { %v735_v62 = vsub.f32 %v3072_v27, %v711_v48  ;;  %v734_v63 = vsub.f32 %v3064_v21, %v711_v48 }
  0xe3   : > { %v731_v52 = vsub.f32 %v729_v50, %v730_v51 }
  0xe5   : > { %v736_v53 = vadd.f32 1e-05, %v731_v52 }
  0xe7   : > { %2703 = vrsqrt.f32 %v736_v53 }
  0xf1   : > { %v2704_v55 = vpop.eup %2703 }
  0xf2   : > { %v738_v57 = vmul.f32 %v2704_v55, %v732_v54  ;;  %v739_v60 = vmul.f32 %v2704_v55, %v733_v56  ;;  %v741_v5 = vmul.f32 %v2704_v55, %v735_v62  ;;  %v740_v6 = vmul.f32 %v2704_v55, %v734_v63 }
 0x149   : > { %v769_v58 = vpop.permute.xlu1 %768 }
 0x14d   : > { %v774_v0 = vpop.permute.xlu1 %773 }
 0x14e   : > { %v745_v59 = vpop.permute.xlu0 %744 }
 0x14f   : > { %v762_v61 = vmul.f32 %v745_v59, %v738_v57 }
 0x151   : > { %v786_v3 = vadd.f32 %v769_v58, %v762_v61  ;;  %v760_v7 = vpop.permute.xlu1 %759 }
 0x152   : > { %v750_v1 = vpop.permute.xlu0 %749  ;;  %v765_v10 = vmul.f32 %v760_v7, %v741_v5  ;;  %v2693_v5 = vld [vmem:[%s3008_s0 + $0x20] sm:$0xff]  }
 0x153   : > { %v763_v2 = vmul.f32 %v750_v1, %v739_v60 }
 0x155   : > { %v787_v4 = vadd.f32 %v774_v0, %v763_v2  ;;  %v784_v12 = vpop.permute.xlu1 %783 }
 0x156   : > { %v755_v8 = vpop.permute.xlu0 %754  ;;  %v789_v14 = vadd.f32 %v784_v12, %v765_v10 }
 0x157   : > { %v790_v9 = vpack.c.bf16 %v787_v4, %v786_v3  ;;  %v764_v11 = vmul.f32 %v755_v8, %v740_v6  ;;  %v2694_v6 = vld [vmem:[%s3008_s0 + $0x28] sm:$0xff]  }
 0x159   : > { %2500 = vmatprep.subr.bf16.mxu0 %v790_v9 }
 0x15a   : > { %v779_v13 = vpop.permute.xlu0 %778  ;;  %2501 = vmatpush3.bf16.msra.mxu0 %v790_v9 }
 0x15b   : > { %v788_v17 = vadd.f32 %v779_v13, %v764_v11 }
 0x15d   : > { %v791_v18 = vpack.c.bf16 %v789_v14, %v788_v17 }
 0x15f   : > { %2502 = vmatprep.subr.bf16.mxu0 %v791_v18 }
 0x160   : > { %2503 = vmatpush3.bf16.msra.mxu0 %v791_v18 }
 0x161   : > { %2540 = vmatprep.subr.bf16.mxu0 %v2836_v23 }
 0x163   : > { %2505 = vmatmul.mubr.msk.bf16.vlgmr.msra.gmra.mrb[0].mxu0 %vm834_vm1, %v2690_v19 }
 0x164   : > { %2508 = vmatprep.mubr.msk.bf16.mxu0 %vm834_vm1, %v2691_v20 }
 0x16b   : > { %2509 = vmatmul.mubr.msk.bf16.gmra.mrb[4].mxu0 %vm834_vm1, %v2692_v22 }
 0x16c   : > { %2512 = vmatprep.mubr.msk.bf16.mxu0 %vm834_vm1, %v2693_v5  ;;  %v1834_v5 = vld [vmem:[%s3033_s28 + $0x10] sm:$0xff] }
 0x173   : > { %2513 = vmatmul.mubr.msk.bf16.gmra.mrb[8].mxu0 %vm834_vm1, %v2694_v6  ;;  %v1836_v6 = vld [vmem:[%s3033_s28 + $0x20] sm:$0xff] }
 0x174   : > { %2542 = vmatprep.mubr.msk.bf16.mxu0 %vm2837_vm3, %v2836_v23 }
 0x236   : > { %v2506_v24 = vpop.f32.mrb[0].mxu0 }
 0x237   : > { %v887_v25 = vpop.f32.mrb[1].mxu0 }
 0x238   : > { %934 = vxpose.xlu0.b32.start.end [1/1] (short) (narrow) %v887_v25, 8  ;;  %v2507_v26 = vpop.f32.mrb[2].mxu0 }
 0x239   : > { %v890_v28 = vpop.f32.mrb[3].mxu0 }
 0x23a   : > { %966 = vxpose.xlu1.b32.start.end [1/1] (short) (narrow) %v890_v28, 8 }
 0x23c   : > { %998 = vxpose.xlu0.b32.start.end [1/1] (short) (narrow) %v2506_v24, 8 }
 0x23e   : > { %v2510_v29 = vpop.f32.mrb[4].mxu0 }
 0x23f   : > { %v903_v30 = vpop.f32.mrb[5].mxu0  ;;  %v1068_v40 = vpack.c.bf16 %v2510_v29, %v2510_v29 }
 0x240   : > { %1030 = vxpose.xlu0.b32.start.end [1/1] (short) (narrow) %v2507_v26, 8  ;;  %v1066_v31 = vpack.c.bf16 %v903_v30, %v903_v30  ;;  %v2511_v32 = vpop.f32.mrb[6].mxu0 }
 0x241   : > { %v906_v33 = vpop.f32.mrb[7].mxu0  ;;  %v1167_v42 = vsel %vm1073_vm4, %v1068_v40, 0  ;;  %v1069_v44 = vpack.c.bf16 %v2511_v32, %v2511_v32 }
 0x242   : > { %v1075_v34 = vsel %vm1073_vm4, %v1066_v31, 0  ;;  %v1067_v35 = vpack.c.bf16 %v906_v33, %v906_v33 }
 0x243   : > { %2517 = vmatpush3.bf16.msra.mxu1 %v1075_v34  ;;  %v1213_v46 = vsel %vm1073_vm4, %v1069_v44, 0 }
 0x244   : > { %2522 = vmatprep.subr.bf16.mxu1 %v2836_v23  ;;  %v1121_v38 = vsel %vm1073_vm4, %v1067_v35, 0 }
 0x2b8   : > { %v950_v36 = vpop.trf.xlu0 }
 0x2b9   : > { %v1062_v37 = vpack.c.bf16 %v950_v36, %v950_v36 }
 0x2ba   : > { %v982_v39 = vpop.trf.xlu1 }
 0x2bb   : > { %2519 = vmatmul.mubr.msk.bf16.vlgmr.msra.gmra.mrb[0].mxu1 %vm696_vm2, %v1062_v37  ;;  %v1063_v41 = vpack.c.bf16 %v982_v39, %v982_v39 }
 0x2bc   : > { %2523 = vmatpush3.bf16.msra.mxu1 %v1121_v38  ;;  %2524 = vmatprep.mubr.msk.bf16.mxu1 %vm2837_vm3, %v2836_v23  ;;  %v1014_v43 = vpop.trf.xlu0 }
 0x2bd   : > { %2528 = vmatprep.subr.bf16.mxu1 %v2836_v23  ;;  %v1064_v45 = vpack.c.bf16 %v1014_v43, %v1014_v43 }
 0x2c0   : > { %v1046_v47 = vpop.trf.xlu0 }
 0x2c1   : > { %v1065_v48 = vpack.c.bf16 %v1046_v47, %v1046_v47 }
 0x2c3   : > { %2525 = vmatmul.mubr.msk.bf16.vlgmr.msra.gmra.mrb[4].mxu1 %vm696_vm2, %v1063_v41  ;;  %v3128_v41 = vpop.f32.mrb[8].mxu0 }
 0x2c4   : > { %2529 = vmatpush3.bf16.msra.mxu1 %v1167_v42  ;;  %2530 = vmatprep.mubr.msk.bf16.mxu1 %vm2837_vm3, %v2836_v23  ;;  %v3130_v42 = vpop.f32.mrb[9].mxu0 }
 0x2c5   : > { %2534 = vmatprep.subr.bf16.mxu1 %v2836_v23  ;;  %v3132_v43 = vpop.f32.mrb[10].mxu0 }
 0x2cb   : > { %2531 = vmatmul.mubr.msk.bf16.vlgmr.msra.gmra.mrb[8].mxu1 %vm696_vm2, %v1064_v45  ;;  %v3134_v45 = vpop.f32.mrb[11].mxu0 }
 0x2cc   : > { %2535 = vmatpush3.bf16.msra.mxu1 %v1213_v46  ;;  %2536 = vmatprep.mubr.msk.bf16.mxu1 %vm2837_vm3, %v2836_v23 }
 0x2cd   : > { %2546 = vmatprep.subr.bf16.mxu1 %v2836_v23 }
 0x2d3   : > { %2537 = vmatmul.mubr.msk.bf16.vlgmr.msra.gmra.mrb[12].mxu1 %vm696_vm2, %v1065_v48 }
 0x2d4   : > { %2548 = vmatprep.mubr.msk.bf16.mxu1 %vm2837_vm3, %v2836_v23 }
 0x38e   : > { %v1111_v49 = vpop.f32.mrb[0].mxu1 }
 0x38f   : > { %v2520_v50 = vpop.f32.mrb[1].mxu1  ;;  %v1255_v51 = vsel %vm696_vm2, %v1111_v49, -inf }
 0x390   : > { %1256 = vmax.xlane.f32.xlu0 %v1255_v51  ;;  %v1114_v52 = vpop.f32.mrb[2].mxu1  ;;  %v1695_v50 = vld [vmem:[%s3003_s17 + $0x8] sm:$0xff]  ;;  %v1696_v51 = vld [vmem:[%s3003_s17 + $0x10] sm:$0xff] }
 0x391   : > { %v2521_v53 = vpop.f32.mrb[3].mxu1  ;;  %v1697_v52 = vld [vmem:[%s3003_s17 + $0x18] sm:$0xff] }
 0x392   : > { %v1723_v53 = vld [vmem:[%s3013_s1 + $0x8] sm:$0xff] }
 0x396   : > { %v1157_v54 = vpop.f32.mrb[4].mxu1 }
 0x397   : > { %v2526_v55 = vpop.f32.mrb[5].mxu1  ;;  %v1258_v56 = vsel %vm696_vm2, %v1157_v54, -inf }
 0x398   : > { %1259 = vmax.xlane.f32.xlu1 %v1258_v56  ;;  %v1160_v57 = vpop.f32.mrb[6].mxu1  ;;  %v1725_v55 = vld [vmem:[%s3013_s1 + $0x18] sm:$0xff] }
 0x399   : > { %v2527_v58 = vpop.f32.mrb[7].mxu1  ;;  %v1729_v56 = vld [vmem:[%s3018_s22 + $0x18] sm:$0xff]  ;;  %v1694_v57 = vld [vmem:[%s3003_s17] sm:$0xff] }
 0x39a   : > { %v1833_v58 = vld [vmem:[%s3033_s28 + $0x8] sm:$0xff] }
 0x39e   : > { %v1203_v59 = vpop.f32.mrb[8].mxu1 }
 0x39f   : > { %v1261_v60 = vsel %vm696_vm2, %v1203_v59, -inf  ;;  %v2532_v61 = vpop.f32.mrb[9].mxu1 }
 0x3a0   : > { %1262 = vmax.xlane.f32.xlu1 %v1261_v60  ;;  %v1206_v62 = vpop.f32.mrb[10].mxu1  ;;  %v1835_v60 = vld [vmem:[%s3033_s28 + $0x18] sm:$0xff]  ;;  %v1726_v61 = vld [vmem:[%s3018_s22] sm:$0xff] }
 0x3a1   : > { %v2533_v63 = vpop.f32.mrb[11].mxu1  ;;  %v1837_v62 = vld [vmem:[%s3033_s28 + $0x28] sm:$0xff] }
 0x3a2   : > { %v1724_v63 = vld [vmem:[%s3013_s1 + $0x10] sm:$0xff] }
 0x3a6   : > { %v1249_v0 = vpop.f32.mrb[12].mxu1 }
 0x3a7   : > { %v1264_v1 = vsel %vm696_vm2, %v1249_v0, -inf  ;;  %v2538_v2 = vpop.f32.mrb[13].mxu1 }
 0x3a8   : > { %1265 = vmax.xlane.f32.xlu0 %v1264_v1  ;;  %v1252_v3 = vpop.f32.mrb[14].mxu1  ;;  %v1728_v1 = vld [vmem:[%s3018_s22 + $0x10] sm:$0xff]  ;;  %v2096_v2 = vld [vmem:[%s3038_s16 + $0x8] sm:$0xff] }
 0x3a9   : > { %v2539_v4 = vpop.f32.mrb[15].mxu1  ;;  %v1832_v3 = vld [vmem:[%s3033_s28] sm:$0xff] }
 0x3aa   : > { %v2098_v4 = vld [vmem:[%s3038_s16 + $0x18] sm:$0xff] }
 0x41d   : > { %v1257_v7 = vpop.xlane.xlu0 %1256 }
 0x41e   : > { %v1267_v8 = vsub.f32 %v1111_v49, %v1257_v7  ;;  %v1838_v7 = vld [vmem:[%s3033_s28 + $0x30] sm:$0xff] }
 0x420   : > { %v1271_v9 = vmul.f32 1.442695, %v1267_v8  ;;  %v2095_v8 = vld [vmem:[%s3038_s16] sm:$0xff] }
 0x422   : > { %2705 = vpow2.f32 %v1271_v9  ;;  %v2097_v9 = vld [vmem:[%s3038_s16 + $0x10] sm:$0xff] }
 0x425   : > { %v1260_v10 = vpop.xlane.xlu1 %1259 }
 0x426   : > { %v1268_v11 = vsub.f32 %v1157_v54, %v1260_v10  ;;  %v1727_v54 = vld [vmem:[%s3018_s22 + $0x8] sm:$0xff] }
 0x428   : > { %v1273_v12 = vmul.f32 1.442695, %v1268_v11 }
 0x42a   : > { %2707 = vpow2.f32 %v1273_v12 }
 0x42c   : > { %v2706_v13 = vpop.eup %2705 }
 0x42d   : > { %v1263_v14 = vpop.xlane.xlu1 %1262  ;;  %v1279_v17 = vsel %vm696_vm2, %v2706_v13, 0.0 }
 0x42e   : > { %v1269_v18 = vsub.f32 %v1203_v59, %v1263_v14  ;;  %1280 = vadd.xlane.f32.xlu1 %v1279_v17  ;;  %v1722_v59 = vld [vmem:[%s3013_s1] sm:$0xff] }
 0x430   : > { %v1275_v19 = vmul.f32 1.442695, %v1269_v18 }
 0x432   : > { %2709 = vpow2.f32 %v1275_v19  ;;  %v1431_v19 = vpack.c.bf16 %v3130_v42, %v3130_v42 }
 0x434   : > { %v2708_v20 = vpop.eup %2707 }
 0x435   : > { %v1266_v22 = vpop.xlane.xlu0 %1265  ;;  %v1282_v24 = vsel %vm696_vm2, %v2708_v20, 0.0 }
 0x436   : > { %v1270_v25 = vsub.f32 %v1249_v0, %v1266_v22  ;;  %1283 = vadd.xlane.f32.xlu0 %v1282_v24  ;;  %v1839_v0 = vld [vmem:[%s3033_s28 + $0x38] sm:$0xff] }
 0x438   : > { %v1277_v26 = vmul.f32 1.442695, %v1270_v25 }
 0x43a   : > { %2711 = vpow2.f32 %v1277_v26 }
 0x43c   : > { %v2710_v28 = vpop.eup %2709 }
 0x43d   : > { %v1285_v29 = vsel %vm696_vm2, %v2710_v28, 0.0 }
 0x43e   : > { %1286 = vadd.xlane.f32.xlu1 %v1285_v29 }
 0x444   : > { %v2712_v30 = vpop.eup %2711 }
 0x445   : > { %v1288_v31 = vsel %vm696_vm2, %v2712_v30, 0.0 }
 0x446   : > { %1289 = vadd.xlane.f32.xlu0 %v1288_v31  ;;  %v1433_v31 = vpack.c.bf16 %v3128_v41, %v3128_v41 }
 0x4bb   : > { %v1281_v32 = vpop.xlane.xlu1 %1280 }
 0x4bc   : > { %2713 = vrcp.f32 %v1281_v32  ;;  %v1434_v32 = vpack.c.bf16 %v3132_v43, %v3132_v43 }
 0x4c3   : > { %v1284_v33 = vpop.xlane.xlu0 %1283 }
 0x4c4   : > { %2715 = vrcp.f32 %v1284_v33 }
 0x4c6   : > { %v2714_v34 = vpop.eup %2713 }
 0x4c7   : > { %v1295_v37 = vmul.f32 %v2714_v34, %v2706_v13 }
 0x4cb   : > { %v1287_v36 = vpop.xlane.xlu1 %1286 }
 0x4cc   : > { %2717 = vrcp.f32 %v1287_v36 }
 0x4ce   : > { %v2716_v35 = vpop.eup %2715 }
 0x4cf   : > { %v1296_v38 = vmul.f32 %v2716_v35, %v2708_v20  ;;  %v1432_v20 = vpack.c.bf16 %v3134_v45, %v3134_v45 }
 0x4d1   : > { %v2675_v39 = vpack.i.bf16 %v1296_v38, %v1295_v37 }
 0x4d3   : > { %2676 = vxpose.xlu1.b32.start.end [1/1] (short) (narrow) %v2675_v39, 8  ;;  %v1290_v40 = vpop.xlane.xlu0 %1289 }
 0x4d4   : > { %2719 = vrcp.f32 %v1290_v40 }
 0x4d6   : > { %v2718_v44 = vpop.eup %2717 }
 0x4d7   : > { %v1297_v47 = vmul.f32 %v2718_v44, %v2710_v28 }
 0x4de   : > { %v2720_v46 = vpop.eup %2719 }
 0x4df   : > { %v1298_v48 = vmul.f32 %v2720_v46, %v2712_v30 }
 0x4e1   : > { %v2682_v49 = vpack.i.bf16 %v1298_v48, %v1297_v47 }
 0x4e3   : > { %2683 = vxpose.xlu0.b32.start.end [1/1] (short) (narrow) %v2682_v49, 8 }
 0x4f1   : > { %1705 = vperm.xlu1 %2674, %v1695_v50  }
 0x4f5   : > { %1710 = vperm.xlu1 %2674, %v1696_v51   ;;  %v2696_v51 = vld [vmem:[%s2998_s25 + $0x8] sm:$0xff]  }
 0x4f9   : > { %1715 = vperm.xlu1 %2674, %v1697_v52   ;;  %v2697_v52 = vld [vmem:[%s3023_s27] sm:$0xff]  }
 0x4fd   : > { %1781 = vperm.xlu1 %2674, %v1723_v53  }
 0x501   : > { %1805 = vperm.xlu1 %2674, %v1727_v54  }
 0x505   : > { %1791 = vperm.xlu1 %2674, %v1725_v55  }
 0x509   : > { %1815 = vperm.xlu1 %2674, %v1729_v56  }
 0x50c   : > { %1700 = vperm.xlu0 %2673, %v1694_v57  }
 0x50d   : > { %1847 = vperm.xlu1 %2674, %v1833_v58  }
 0x510   : > { %1776 = vperm.xlu0 %2673, %v1722_v59  }
 0x511   : > { %1857 = vperm.xlu1 %2674, %v1835_v60  }
 0x514   : > { %1800 = vperm.xlu0 %2673, %v1726_v61  }
 0x515   : > { %1867 = vperm.xlu1 %2674, %v1837_v62  }
 0x518   : > { %1786 = vperm.xlu0 %2673, %v1724_v63  }
 0x519   : > { %1877 = vperm.xlu1 %2674, %v1839_v0  }
 0x51c   : > { %1810 = vperm.xlu0 %2673, %v1728_v1  }
 0x51d   : > { %2106 = vperm.xlu1 %2674, %v2096_v2  }
 0x520   : > { %1842 = vperm.xlu0 %2673, %v1832_v3  }
 0x521   : > { %2116 = vperm.xlu1 %2674, %v2098_v4  }
 0x524   : > { %1852 = vperm.xlu0 %2673, %v1834_v5  }
 0x528   : > { %1862 = vperm.xlu0 %2673, %v1836_v6  }
 0x52c   : > { %1872 = vperm.xlu0 %2673, %v1838_v7  }
 0x530   : > { %2101 = vperm.xlu0 %2673, %v2095_v8  }
 0x534   : > { %2111 = vperm.xlu0 %2673, %v2097_v9  }
 0x553   : > { %v2677_v10 = vpop.trf.xlu1 }
 0x554   : > { %v2681_v11 = vunpack.i.h.bf16 %v2677_v10  ;;  %v2678_v12 = vunpack.i.l.bf16 %v2677_v10 }
 0x556   : > { %v1427_v13 = vpack.c.bf16 %v2678_v12, %v2678_v12  ;;  %v1428_v14 = vpack.c.bf16 %v2681_v11, %v2681_v11 }
 0x558   : > { %v1439_v17 = vsel %vm1073_vm4, %v1427_v13, 0  ;;  %v1485_v18 = vsel %vm1073_vm4, %v1428_v14, 0 }
 0x559   : > { %2541 = vmatpush3.bf16.msra.mxu0 %v1439_v17  ;;  %2547 = vmatpush3.bf16.msra.mxu1 %v1485_v18 }
 0x55a   : > { %2552 = vmatprep.subr.bf16.mxu0 %v2836_v23  ;;  %2558 = vmatprep.subr.bf16.mxu1 %v2836_v23 }
 0x55c   : > { %2543 = vmatmul.mubr.msk.bf16.vlgmr.msra.gmra.mrb[12].mxu0 %vm696_vm2, %v1431_v19  ;;  %2549 = vmatmul.mubr.msk.bf16.vlgmr.msra.gmra.mrb[16].mxu1 %vm696_vm2, %v1432_v20 }
 0x55d   : > { %2554 = vmatprep.mubr.msk.bf16.mxu0 %vm2837_vm3, %v2836_v23  ;;  %2560 = vmatprep.mubr.msk.bf16.mxu1 %vm2837_vm3, %v2836_v23  ;;  %v2695_v23 = vld [vmem:[%s2998_s25] sm:$0xff]  }
 0x563   : > { %v2684_v22 = vpop.trf.xlu0 }
 0x564   : > { %v2688_v24 = vunpack.i.h.bf16 %v2684_v22  ;;  %v2685_v25 = vunpack.i.l.bf16 %v2684_v22 }
 0x566   : > { %v1429_v26 = vpack.c.bf16 %v2685_v25, %v2685_v25  ;;  %v1430_v28 = vpack.c.bf16 %v2688_v24, %v2688_v24 }
 0x568   : > { %v1531_v29 = vsel %vm1073_vm4, %v1429_v26, 0  ;;  %v1577_v30 = vsel %vm1073_vm4, %v1430_v28, 0 }
 0x569   : > { %2553 = vmatpush3.bf16.msra.mxu0 %v1531_v29  ;;  %2559 = vmatpush3.bf16.msra.mxu1 %v1577_v30 }
 0x56c   : > { %2555 = vmatmul.mubr.msk.bf16.vlgmr.msra.gmra.mrb[16].mxu0 %vm696_vm2, %v1433_v31  ;;  %2561 = vmatmul.mubr.msk.bf16.vlgmr.msra.gmra.mrb[20].mxu1 %vm696_vm2, %v1434_v32 }
 0x56d   : > { %2568 = vmatprep.mubr.msk.bf16.mxu0 %vm834_vm1, %v2695_v23  ;;  %2576 = vmatprep.mubr.msk.bf16.mxu1 %vm834_vm1, %v2697_v52 }
 0x570   : > { %v1706_v53 = vpop.permute.xlu1 %1705 }
 0x574   : > { %v1711_v54 = vpop.permute.xlu1 %1710 }
 0x578   : > { %v1716_v2 = vpop.permute.xlu1 %1715 }
 0x58b   : > { %v1701_v60 = vpop.permute.xlu0 %1700 }
 0x62f   : > { %v1475_v33 = vpop.f32.mrb[12].mxu0  ;;  %v1521_v34 = vpop.f32.mrb[16].mxu1 }
 0x630   : > { %v1619_v35 = vpack.c.bf16 %v1521_v34, %v1475_v33  ;;  %v2544_v36 = vpop.f32.mrb[13].mxu0  ;;  %v2550_v37 = vpop.f32.mrb[17].mxu1 }
 0x631   : > { %v1478_v38 = vpop.f32.mrb[14].mxu0  ;;  %v1524_v39 = vpop.f32.mrb[18].mxu1 }
 0x632   : > { %v2545_v40 = vpop.f32.mrb[15].mxu0  ;;  %v2551_v41 = vpop.f32.mrb[19].mxu1  ;;  %2564 = vmatprep.subr.bf16.mxu0 %v1619_v35 }
 0x633   : > { %2565 = vmatpush3.bf16.msra.mxu0 %v1619_v35  ;;  %v1782_v38 = vpop.permute.xlu1 %1781  ;;  %v1777_v39 = vpop.permute.xlu0 %1776 }
 0x63f   : > { %v1567_v42 = vpop.f32.mrb[16].mxu0  ;;  %v1613_v43 = vpop.f32.mrb[20].mxu1 }
 0x640   : > { %v1620_v44 = vpack.c.bf16 %v1613_v43, %v1567_v42  ;;  %v2556_v45 = vpop.f32.mrb[17].mxu0  ;;  %v2562_v46 = vpop.f32.mrb[21].mxu1 }
 0x641   : > { %v1570_v47 = vpop.f32.mrb[18].mxu0  ;;  %v1616_v48 = vpop.f32.mrb[22].mxu1 }
 0x642   : > { %v2557_v49 = vpop.f32.mrb[19].mxu0  ;;  %v2563_v50 = vpop.f32.mrb[23].mxu1  ;;  %2566 = vmatprep.subr.bf16.mxu0 %v1620_v44 }
 0x643   : > { %2567 = vmatpush3.bf16.msra.mxu0 %v1620_v44  ;;  %v1806_v42 = vpop.permute.xlu1 %1805  ;;  %v1801_v43 = vpop.permute.xlu0 %1800 }
 0x646   : > { %2569 = vmatmul.mubr.msk.bf16.vlgmr.msra.gmra.mrb[20].mxu0 %vm834_vm1, %v2696_v51 }
 0x647   : > { %v1792_v44 = vpop.permute.xlu1 %1791  ;;  %v1787_v45 = vpop.permute.xlu0 %1786 }
 0x719   : > { %v2570_v55 = vpop.f32.mrb[20].mxu0 }
 0x71a   : > { %v1692_v56 = vadd.f32 %v2570_v55, %v3064_v21  ;;  %v1675_v57 = vpop.f32.mrb[21].mxu0 }
 0x71b   : > { %v1690_v58 = vadd.f32 %v1675_v57, %v3052_v15  ;;  %v2571_v59 = vpop.f32.mrb[22].mxu0 }
 0x71c   : > { %v1693_v61 = vadd.f32 %v2571_v59, %v3072_v27  ;;  %v1678_v62 = vpop.f32.mrb[23].mxu0  ;;  %v3191_v63 = vadd.f32 %v1711_v54, %v1692_v56  ;;  %v1816_v59 = vpop.permute.xlu1 %1815 }
 0x71d   : > { %v3193_v0 = vadd.f32 %v1701_v60, %v1690_v58  ;;  %v1691_v1 = vadd.f32 %v1678_v62, %v3054_v16  ;;  %v1811_v60 = vpop.permute.xlu0 %1810 }
 0x71e   : > { %v3198_v4 = vadd.f32 %v1716_v2, %v1693_v61  ;;  %v1746_v15 = vmul.f32 %v3191_v63, %v3191_v63  ;;  %v1733_v7 = vsel %vm696_vm2, %v3191_v63, 0.0 }
 0x71f   : > { %v1744_v3 = vmul.f32 %v3193_v0, %v3193_v0  ;;  %v3200_v21 = vadd.f32 %v1706_v53, %v1691_v1  ;;  %v1730_v27 = vsel %vm696_vm2, %v3193_v0, 0.0 }
 0x720   : > { %v1747_v9 = vmul.f32 %v3198_v4, %v3198_v4  ;;  %v1751_v13 = vsel %vm696_vm2, %v1746_v15, 0.0  ;;  %v1735_v14 = vsel %vm696_vm2, %v3198_v4, 0.0 }
 0x721   : > { %v1731_v5 = vsel %vm696_vm2, %v3200_v21, 0.0  ;;  %v1745_v16 = vmul.f32 %v3200_v21, %v3200_v21  ;;  %v1748_v8 = vsel %vm696_vm2, %v1744_v3, 0.0 }
 0x722   : > { %v1732_v6 = vadd.f32 %v1731_v5, %v1730_v27  ;;  %v1753_v19 = vsel %vm696_vm2, %v1747_v9, 0.0  ;;  %v2698_v27 = vld [vmem:[%s3023_s27 + $0x8] sm:$0xff]   ;;  %v2699_v5 = vld [vmem:[%s3023_s27 + $0x10] sm:$0xff]  }
 0x723   : > { %v1749_v10 = vsel %vm696_vm2, %v1745_v16, 0.0  ;;  %v2700_v16 = vld [vmem:[%s3023_s27 + $0x18] sm:$0xff]  }
 0x724   : > { %v1734_v11 = vadd.f32 %v1733_v7, %v1732_v6  ;;  %v1750_v12 = vadd.f32 %v1749_v10, %v1748_v8  ;;  %v2701_v6 = vld [vmem:[%s3028_s12] sm:$0xff]   ;;  %v1843_v7 = vpop.permute.xlu0 %1842  ;;  %v1848_v8 = vpop.permute.xlu1 %1847 }
 0x725   : > { %2592 = vmatprep.mubr.msk.bf16.mxu0 %vm2035_vm5, %v2701_v6 }
 0x726   : > { %v1736_v17 = vadd.f32 %v1735_v14, %v1734_v11  ;;  %v1752_v18 = vadd.f32 %v1751_v13, %v1750_v12 }
 0x728   : > { %v1737_v20 = vrot.slane %v1736_v17, 4  ;;  %v1754_v22 = vadd.f32 %v1753_v19, %v1752_v18  ;;  %v1853_v9 = vpop.permute.xlu0 %1852  ;;  %v1858_v10 = vpop.permute.xlu1 %1857 }
 0x72a   : > { %v1738_v24 = vadd.f32 %v1737_v20, %v1736_v17  ;;  %v1755_v25 = vrot.slane %v1754_v22, 4 }
 0x72c   : > { %v1739_v26 = vrot.slane %v1738_v24, 2  ;;  %v1756_v28 = vadd.f32 %v1755_v25, %v1754_v22  ;;  %v1863_v14 = vpop.permute.xlu0 %1862 }
 0x72e   : > { %v1740_v29 = vadd.f32 %v1739_v26, %v1738_v24  ;;  %v1757_v30 = vrot.slane %v1756_v28, 2  ;;  %v1868_v24 = vpop.permute.xlu1 %1867 }
 0x730   : > { %v1741_v31 = vrot.slane %v1740_v29, 1  ;;  %v1758_v32 = vadd.f32 %v1757_v30, %v1756_v28  ;;  %v1873_v30 = vpop.permute.xlu0 %1872 }
 0x732   : > { %v1742_v23 = vadd.f32 %v1741_v31, %v1740_v29  ;;  %v1759_v33 = vrot.slane %v1758_v32, 1 }
 0x734   : > { %v1743_v34 = vmul.f32 0.03125, %v1742_v23  ;;  %v1760_v35 = vadd.f32 %v1759_v33, %v1758_v32  ;;  %v1878_v33 = vpop.permute.xlu1 %1877 }
 0x736   : > { %v1761_v36 = vmul.f32 0.03125, %v1760_v35  ;;  %v1762_v37 = vmul.f32 %v1743_v34, %v1743_v34  ;;  %v1765_v46 = vsub.f32 %v3200_v21, %v1743_v34  ;;  %v1764_v47 = vsub.f32 %v3193_v0, %v1743_v34 }
 0x737   : > { %v1766_v48 = vsub.f32 %v3191_v63, %v1743_v34  ;;  %v1767_v49 = vsub.f32 %v3198_v4, %v1743_v34 }
 0x738   : > { %v1763_v40 = vsub.f32 %v1761_v36, %v1762_v37 }
 0x73a   : > { %v1768_v41 = vadd.f32 1e-05, %v1763_v40 }
 0x73c   : > { %2721 = vrsqrt.f32 %v1768_v41 }
 0x746   : > { %v2722_v50 = vpop.eup %2721 }
 0x747   : > { %v1770_v51 = vmul.f32 %v2722_v50, %v1764_v47  ;;  %v1771_v52 = vmul.f32 %v2722_v50, %v1765_v46  ;;  %v1772_v53 = vmul.f32 %v2722_v50, %v1766_v48  ;;  %v1773_v54 = vmul.f32 %v2722_v50, %v1767_v49 }
 0x749   : > { %v1794_v55 = vmul.f32 %v1777_v39, %v1770_v51  ;;  %v1795_v56 = vmul.f32 %v1782_v38, %v1771_v52  ;;  %v1796_v57 = vmul.f32 %v1787_v45, %v1772_v53  ;;  %v1797_v58 = vmul.f32 %v1792_v44, %v1773_v54 }
 0x74b   : > { %v1818_v61 = vadd.f32 %v1801_v43, %v1794_v55  ;;  %v1819_v62 = vadd.f32 %v1806_v42, %v1795_v56  ;;  %v1820_v1 = vadd.f32 %v1811_v60, %v1796_v57  ;;  %v1821_v2 = vadd.f32 %v1816_v59, %v1797_v58 }
 0x74d   : > { %v1822_v3 = vpack.c.bf16 %v1819_v62, %v1818_v61  ;;  %v1823_v15 = vpack.c.bf16 %v1821_v2, %v1820_v1 }
 0x74f   : > { %2572 = vmatprep.subr.bf16.mxu1 %v1822_v3 }
 0x750   : > { %2573 = vmatpush3.bf16.msra.mxu1 %v1822_v3 }
 0x751   : > { %2574 = vmatprep.subr.bf16.mxu1 %v1823_v15 }
 0x754   : > { %2575 = vmatpush3.bf16.msra.mxu1 %v1823_v15 }
 0x757   : > { %2577 = vmatmul.mubr.msk.bf16.vlgmr.msra.gmra.mrb[24].mxu1 %vm834_vm1, %v2698_v27 }
 0x758   : > { %2580 = vmatprep.mubr.msk.bf16.mxu1 %vm834_vm1, %v2699_v5 }
 0x75f   : > { %2581 = vmatmul.mubr.msk.bf16.gmra.mrb[28].mxu1 %vm834_vm1, %v2700_v16 }
 0x82a   : > { %v2578_v11 = vpop.f32.mrb[24].mxu1 }
 0x82b   : > { %v1955_v12 = vadd.f32 %v2578_v11, %v1853_v9  ;;  %v1946_v13 = vpop.f32.mrb[25].mxu1 }
 0x82c   : > { %v1947_v17 = vadd.f32 %v1946_v13, %v1843_v7  ;;  %v2579_v18 = vpop.f32.mrb[26].mxu1 }
 0x82d   : > { %v1987_v19 = vmul.f32 0.70710677, %v1955_v12  ;;  %v1958_v20 = vadd.f32 %v2579_v18, %v1858_v10  ;;  %v1949_v22 = vpop.f32.mrb[27].mxu1  ;;  %v1979_v49 = vmul.f32 0.5, %v1955_v12  ;;  %v2102_v18 = vpop.permute.xlu0 %2101 }
 0x82e   : > { %v1985_v25 = vmul.f32 0.70710677, %v1947_v17  ;;  %v1950_v26 = vadd.f32 %v1949_v22, %v1848_v8  ;;  %v1977_v52 = vmul.f32 0.5, %v1947_v17  ;;  %v2702_v17 = vld [vmem:[%s3028_s12 + $0x8] sm:$0xff]  }
 0x82f   : > { %2723 = verf.f32 %v1987_v19  ;;  %v1988_v28 = vmul.f32 0.70710677, %v1958_v20  ;;  %v1980_v50 = vmul.f32 0.5, %v1958_v20  ;;  %v2107_v19 = vpop.permute.xlu1 %2106 }
 0x830   : > { %2725 = verf.f32 %v1985_v25  ;;  %v1986_v29 = vmul.f32 0.70710677, %v1950_v26  ;;  %v1978_v53 = vmul.f32 0.5, %v1950_v26 }
 0x831   : > { %2727 = verf.f32 %v1988_v28  ;;  %v2112_v25 = vpop.permute.xlu0 %2111 }
 0x832   : > { %2729 = verf.f32 %v1986_v29  ;;  %v2582_v31 = vpop.f32.mrb[28].mxu1 }
 0x833   : > { %v1971_v32 = vadd.f32 %v2582_v31, %v1873_v30  ;;  %v1962_v23 = vpop.f32.mrb[29].mxu1 }
 0x834   : > { %v1963_v34 = vadd.f32 %v1962_v23, %v1863_v14  ;;  %v2583_v35 = vpop.f32.mrb[30].mxu1 }
 0x835   : > { %v1991_v36 = vmul.f32 0.70710677, %v1971_v32  ;;  %v1974_v37 = vadd.f32 %v2583_v35, %v1878_v33  ;;  %v1965_v38 = vpop.f32.mrb[31].mxu1  ;;  %v1983_v27 = vmul.f32 0.5, %v1971_v32  ;;  %v2117_v32 = vpop.permute.xlu1 %2116 }
 0x836   : > { %v1989_v39 = vmul.f32 0.70710677, %v1963_v34  ;;  %v1966_v40 = vadd.f32 %v1965_v38, %v1868_v24  ;;  %v1981_v6 = vmul.f32 0.5, %v1963_v34 }
 0x837   : > { %2731 = verf.f32 %v1991_v36  ;;  %v1992_v41 = vmul.f32 0.70710677, %v1974_v37  ;;  %v1984_v5 = vmul.f32 0.5, %v1974_v37 }
 0x838   : > { %2733 = verf.f32 %v1989_v39  ;;  %v1990_v42 = vmul.f32 0.70710677, %v1966_v40  ;;  %v1982_v7 = vmul.f32 0.5, %v1966_v40 }
 0x839   : > { %v2724_v43 = vpop.eup %2723  ;;  %2735 = verf.f32 %v1992_v41 }
 0x83a   : > { %v2726_v44 = vpop.eup %2725  ;;  %v2003_v45 = vadd.f32 1.0, %v2724_v43  ;;  %2737 = verf.f32 %v1990_v42 }
 0x83b   : > { %v2728_v46 = vpop.eup %2727  ;;  %v2001_v47 = vadd.f32 1.0, %v2726_v44 }
 0x83c   : > { %v2730_v48 = vpop.eup %2729  ;;  %v2004_v51 = vadd.f32 1.0, %v2728_v46  ;;  %v2011_v55 = vmul.f32 %v2003_v45, %v1979_v49 }
 0x83d   : > { %v2002_v54 = vadd.f32 1.0, %v2730_v48  ;;  %v2009_v57 = vmul.f32 %v2001_v47, %v1977_v52 }
 0x83e   : > { %v2012_v56 = vmul.f32 %v2004_v51, %v1980_v50 }
 0x83f   : > { %v2010_v58 = vmul.f32 %v2002_v54, %v1978_v53 }
 0x840   : > { %v2018_v59 = vpack.c.bf16 %v2012_v56, %v2011_v55 }
 0x841   : > { %v2732_v60 = vpop.eup %2731  ;;  %v2017_v61 = vpack.c.bf16 %v2010_v58, %v2009_v57 }
 0x842   : > { %v2734_v62 = vpop.eup %2733  ;;  %v2007_v1 = vadd.f32 1.0, %v2732_v60 }
 0x843   : > { %v2736_v2 = vpop.eup %2735  ;;  %v2005_v3 = vadd.f32 1.0, %v2734_v62  ;;  %2584 = vmatprep.subr.bf16.mxu0 %v2017_v61 }
 0x844   : > { %v2738_v15 = vpop.eup %2737  ;;  %v2008_v16 = vadd.f32 1.0, %v2736_v2  ;;  %2585 = vmatpush3.bf16.msra.mxu0 %v2017_v61  ;;  %v2015_v9 = vmul.f32 %v2007_v1, %v1983_v27 }
 0x845   : > { %v2006_v8 = vadd.f32 1.0, %v2738_v15  ;;  %2586 = vmatprep.subr.bf16.mxu0 %v2018_v59  ;;  %v2013_v11 = vmul.f32 %v2005_v3, %v1981_v6 }
 0x846   : > { %v2016_v10 = vmul.f32 %v2008_v16, %v1984_v5 }
 0x847   : > { %v2014_v12 = vmul.f32 %v2006_v8, %v1982_v7 }
 0x848   : > { %2587 = vmatpush3.bf16.msra.mxu0 %v2018_v59  ;;  %v2020_v13 = vpack.c.bf16 %v2016_v10, %v2015_v9 }
 0x849   : > { %v2019_v14 = vpack.c.bf16 %v2014_v12, %v2013_v11 }
 0x84b   : > { %2588 = vmatprep.subr.bf16.mxu0 %v2019_v14 }
 0x84c   : > { %2589 = vmatpush3.bf16.msra.mxu0 %v2019_v14 }
 0x84d   : > { %2590 = vmatprep.subr.bf16.mxu0 %v2020_v13 }
 0x850   : > { %2591 = vmatpush3.bf16.msra.mxu0 %v2020_v13 }
 0x853   : > { %2593 = vmatmul.mubr.msk.bf16.vlgmr.msra.gmra.mrb[24].mxu0 %vm2035_vm5, %v2702_v17 }
 0x926   : > { %v2594_v20 = vpop.f32.mrb[24].mxu0 }
 0x927   : > { %v2093_v22 = vadd.f32 %v2594_v20, %v3191_v63  ;;  %v2076_v24 = vpop.f32.mrb[25].mxu0 }
 0x928   : > { %v2091_v26 = vadd.f32 %v2076_v24, %v3193_v0  ;;  %v2595_v28 = vpop.f32.mrb[26].mxu0  ;;  %2130 = sbr.rel (%p2445_p1) target bundleno = 2478 (0x9ae), region = 76 }
 0x929   : > { %v2121_v29 = vadd.f32 %v2112_v25, %v2093_v22  ;;  %v2094_v30 = vadd.f32 %v2595_v28, %v3198_v4  ;;  %v2079_v31 = vpop.f32.mrb[27].mxu0 }
 0x92a   : > { %v2119_v23 = vadd.f32 %v2102_v18, %v2091_v26  ;;  %v2092_v33 = vadd.f32 %v2079_v31, %v3200_v21 }
 0x92b   : > { %2125 = vst.msk [vmem:[#allocation2 + $0x10] sm:$0xff] %vm696_vm2, %v2121_v29  ;;  %v2122_v34 = vadd.f32 %v2117_v32, %v2094_v30 }
 0x92c   : > { %2123 = vst.msk [vmem:[#allocation2] sm:$0xff] %vm696_vm2, %v2119_v23  ;;  %v2120_v35 = vadd.f32 %v2107_v19, %v2092_v33  ;;  %2131 = vxpose.xlu0.b32.start [1/4] (short) (narrow) (!%p2445_p1), %v2119_v23, 8 }
 0x92d   : > { %2126 = vst.msk [vmem:[#allocation2 + $0x18] sm:$0xff] %vm696_vm2, %v2122_v34 }
 0x92e   : > { %2124 = vst.msk [vmem:[#allocation2 + $0x8] sm:$0xff] %vm696_vm2, %v2120_v35 }
 0x930   : > { %2132 = vxpose.xlu0.b32.cont [2/4] (short) (narrow) %v2120_v35, 8 }
 0x934   : > { %2133 = vxpose.xlu0.b32.cont [3/4] (short) (narrow) %v2121_v29, 8 }
 0x938   : > { %2134 = vxpose.xlu0.b32.end [4/4] (short) (narrow) %v2122_v34, 8 }
 0x9ac   : > { %v2147_v63 = vpop.trf.xlu0 }
 0x9ad   : > { %2163 = vst.msk [vmem:[%s581_s6] sm:$0xff] %vm834_vm1, %v2147_v63 }
 0x9ae PF: > { %s3360_s0 = sld [smem:[#allocation9_spill]]  ;;  %s3363_s13 = sld [smem:[#allocation26_spill]] }
 0x9af   : > { %s3361_s1 = sld [smem:[#allocation7_spill]]  ;;  %s2178_s15 = sshll.u32 %s581_s6, 4  ;;  %s2179_s15 = int_to_ptr.vmem [resolvable:$true] %s2178_s15 }
 0x9b0   : > { %s2739_s17 = scalar_lea.vmem %s2179_s15, 128  ;;  %s2838_s22 = smov [#allocation3]  }
 0x9b1   : > { %p2740_p2 = scmp.ne.s32.totalorder %s2179_s15, %s2739_s17  ;;  %s2743_s30 = sshll.u32 %s2838_s22, 4  ;;  %s2744_s30 = int_to_ptr.vmem [resolvable:$false] %s2743_s30 }
 0x9b2   : > { %s2745_s27 = scalar_lea.vmem %s2744_s30, 256  ;;  %p2746_p6 = scmp.lt.s32.totalorder %s2179_s15, %s2744_s30 }
 0x9b3   : > { %p2741_p4 = pnand %p2740_p2, %p2953_p3  ;;  %p2747_p7 = scmp.lt.s32.totalorder %s2745_s27, %s2739_s17 }
 0x9b4   : > { %s2447_s5 = sshll.u32 %s3360_s0, 7 }
 0x9b5   : > { %s3250_s24 = scalar_lea.hbm %s3363_s13, %s2447_s5  ;;  %s3364_s20 = sand.u32 1, %s3361_s1  }
 0x9b6   : > { %s2165_s18 = scalar_lea.sflag [#allocation4], %s3364_s20  ;;  %p2742_p5 = pneg %p2741_p4 }
 0x9b7   : > { %p2748_p8 = por %p2747_p7, %p2746_p6 }
 0x9b9   : > { %p2749_p10 = pnand %p2748_p8, %p2742_p5 }
 0x9bb   : > { %2752 = shalt.err (!%p2749_p10)
}
 0x9bc   : > { %s2753_s6 = scalar_lea.hbm %s3250_s24, 128  ;;  %s2757_s23 = scalar_lea.hbm %s3363_s13, 256 }
 0x9bd   : > { %p2754_p11 = scmp.ne.s32.totalorder %s3250_s24, %s2753_s6  ;;  %p2758_p0 = scmp.lt.u32.totalorder %s3250_s24, %s3363_s13 }
 0x9be   : > { %p2759_p1 = scmp.lt.u32.totalorder %s2757_s23, %s2753_s6  ;;  %p2761_p4 = scmp.lt.u32.totalorder %s2753_s6, %s3250_s24 }
 0x9bf   : > { %p2755_p12 = pnand %p2754_p11, %p2953_p3 }
 0x9c0   : > { %p2760_p2 = por %p2759_p1, %p2758_p0 }
 0x9c1   : > { %p2756_p13 = pneg %p2755_p12 }
 0x9c2   : > { %p2762_p5 = por %p2761_p4, %p2760_p2 }
 0x9c4   : > { %p2763_p6 = pnand %p2762_p5, %p2756_p13 }
 0x9c6   : > { %2766 = shalt.err (!%p2763_p6)
}
 0x9c7   : > { %2597 = dma.vmem_to_hbm [thread:$0]  (%p2953_p3), %s2179_s15, 128, %s3250_s24, %s2165_s18  }
 0x9c8 PF: > { %s3365_s21 = sld [smem:[#allocation12_spill]]  ;;  %s3366_s28 = sld [smem:[#allocation6_spill]] }
 0x9ce   : > { %p2603_p7 = scmp.ge.s32.totalorder %s3365_s21, 2  ;;  %s2190_s16 = sand.u32 1, %s3366_s28  }
 0x9cf   : > { %s2191_s3 = scalar_lea.sflag [#allocation4], %s2190_s16 }
 0x9d0   : > { %p2600_p8 = pnand %p2603_p7, %p2963_p9 }
 0x9d2   : > { %2800 = dma.done.wait (!%p2600_p8), %s2191_s3, 128  }
 0x9d3   : > { %2802 = vsyncadd (!%p2600_p8), %s2191_s3, 4294967168  ;;  %s25_s28 = sadd.s32 1, %s3365_s21   ;;  %s3368_s21 = sld [smem:[#allocation7_spill]] }
 0x9d4   : > { %p22_p10 = scmp.ge.s32.totalorder %s25_s28, 6   ;;  %s3369_s22 = sld [smem:[#allocation8_spill]] }
 0x9d5   : > { %s3370_s23 = sld [smem:[#allocation17_spill]]  ;;  %s3371_s24 = sld [smem:[#allocation10_spill]] }
 0x9d6   : > { %s3372_s25 = sld [smem:[#allocation11_spill]]  ;;  %s3373_s26 = sld [smem:[#allocation13_spill]] }
 0x9d7   : > { %s3374_s27 = sld [smem:[#allocation15_spill]]  ;;  %24 = sbr.rel (!%p22_p10) target bundleno = 14 (0xe), region = 144 }
 0x9de   :  { %2196 = vsyncpa [#allocation4], 1 }
 0x9df   :  { %2198 = vsyncpa [#allocation4 + $0x1], 1 }

</bundles_post_ra>
